<compile_context>
chip_gen: v6e
topology: v6e:2x2x1
jax: 0.10.0
libtpu: 0.0.40
codegen_flags: <defaults>
</compile_context>

<pallas_src>
import jax
import jax.numpy as jnp
from jax.experimental import pallas as pl
from jax.experimental.pallas import tpu as pltpu

EMBEDDING_DIM = 768
HIDDEN_DIM = 64
NUM_ENCODERS = 5
# PyTorch multiplies: frame * agent_id * state * action * task.
# Inputs/params are ordered (frame, agent_id, state, task, action) -> (0,1,2,4,3).
ENCODER_MUL_ORDER = (0, 1, 2, 4, 3)
DEFAULT_BATCH_TILE = 1024  # rows per grid step (bf16 x: ~15.7 MiB double-buffered)


def _rl_kernel(x0_ref, x1_ref, x2_ref, x3_ref, x4_ref,
               w1_ref, b1_ref, scale_ref, shift_ref, w2_ref, b2_ref,
               out_ref):
    # x*_ref : (TB, E) bf16      w1_ref: (5, E, H) bf16   b1_ref: (5, 1, H) f32
    # scale/shift: (5,) f32 SMEM w2_ref: (5, H, H) bf16   b2_ref: (5, 1, H) f32
    # out_ref: (1, TB) f32  (lane-dense mean over hidden dim)
    x_refs = (x0_ref, x1_ref, x2_ref, x3_ref, x4_ref)
    h_dim = w2_ref.shape[-1]

    prod = None
    for i in ENCODER_MUL_ORDER:  # static unroll, PyTorch multiplication order
        # fc1: bf16 x bf16 on the MXU, f32 accumulate
        h = jnp.dot(x_refs[i][...], w1_ref[i],
                    preferred_element_type=jnp.float32) + b1_ref[i]
        # sigmoid (EUP) * scale + shift  (per-encoder scalars from SMEM)
        h = jax.nn.sigmoid(h) * scale_ref[i] + shift_ref[i]
        # fc2: bf16 MXU matmul, f32 accumulate (no HIGHEST decomposition)
        y = jnp.dot(h.astype(jnp.bfloat16), w2_ref[i],
                    preferred_element_type=jnp.float32) + b2_ref[i]
        prod = y if prod is None else prod * y

    # mean over hidden dim, emitted directly as a (1, TB) lane-major row so the
    # store is lane-dense (avoids last-dim-1 masked stores).  Padded rows (ragged
    # batch tail) only produce garbage in their own output lanes, which are
    # masked on writeback.
    inv_h = jnp.full((1, h_dim), 1.0 / h_dim, dtype=jnp.float32)
    out_ref[...] = jax.lax.dot_general(
        inv_h, prod,
        dimension_numbers=(((1,), (1,)), ((), ())),
        preferred_element_type=jnp.float32)


def _round_up(x, m):
    return ((x + m - 1) // m) * m


def _pick_batch_tile(B, batch_tile):
    if B <= 128:
        return B                                   # single block, full-extent dims
    if B <= 2 * batch_tile:
        # >= 2 grid steps so "parallel" shards across both v7x TensorCores;
        # TB stays a multiple of 128 -> lane-aligned (1, TB) output blocks.
        return _round_up(pl.cdiv(B, 2), 128)
    return batch_tile


def rl_model_forward(frame_embedding, agent_id_embedding, state_embedding,
                     task_embedding, action_embedding, params,
                     *, batch_tile=DEFAULT_BATCH_TILE):
    """Inputs: 5 arrays of shape (B, 1, E) (PyTorch convention). Returns (B, 1)."""
    embeddings = (frame_embedding, agent_id_embedding, state_embedding,
                  task_embedding, action_embedding)
    # (B, 1, E) -> (B, E) is a free reshape.  The kernel consumes bf16
    # activations; produce embeddings in bf16 upstream so the astype below is a
    # no-op (it fuses into the producer under jit otherwise).
    xs = [e.reshape(e.shape[0], e.shape[-1]).astype(jnp.bfloat16)
          for e in embeddings]
    B, E = xs[0].shape
    H = params["w2"].shape[-1]

    TB = _pick_batch_tile(B, batch_tile)
    grid = (pl.cdiv(B, TB),)

    x_spec = pl.BlockSpec((TB, E), lambda i: (i, 0))
    const3 = lambda i: (0, 0, 0)  # weights stay VMEM-resident across grid steps
    smem = pl.BlockSpec(memory_space=pltpu.MemorySpace.SMEM)
    in_specs = (
        [x_spec] * NUM_ENCODERS
        + [pl.BlockSpec((NUM_ENCODERS, E, H), const3),   # w1 (bf16)
           pl.BlockSpec((NUM_ENCODERS, 1, H), const3),   # b1 (f32)
           smem,                                         # scale
           smem,                                         # shift
           pl.BlockSpec((NUM_ENCODERS, H, H), const3),   # w2 (bf16)
           pl.BlockSpec((NUM_ENCODERS, 1, H), const3)]   # b2 (f32)
    )
    out_spec = pl.BlockSpec((1, TB), lambda i: (0, i))

    flops = NUM_ENCODERS * 2 * B * (E * H + H * H) + 2 * B * H
    transcendentals = NUM_ENCODERS * B * H
    bytes_accessed = (NUM_ENCODERS * B * E * 2      # activations (bf16)
                      + NUM_ENCODERS * E * H * 2    # w1 (bf16)
                      + NUM_ENCODERS * H * H * 2    # w2 (bf16)
                      + 2 * NUM_ENCODERS * H * 4    # biases (f32)
                      + 2 * NUM_ENCODERS * 4        # scale/shift
                      + B * 4)                      # output (f32)

    out = pl.pallas_call(
        _rl_kernel,
        out_shape=jax.ShapeDtypeStruct((1, B), jnp.float32),
        grid=grid,
        in_specs=in_specs,
        out_specs=out_spec,
        compiler_params=pltpu.CompilerParams(
            dimension_semantics=("parallel",),          # 2x on v7x's two TCs
            vmem_limit_bytes=48 * 1024 * 1024),         # TB=1024 bf16 tiles fit everywhere
        cost_estimate=pl.CostEstimate(
            flops=flops, transcendentals=transcendentals,
            bytes_accessed=bytes_accessed),
    )(*xs, params["w1"], params["b1"], params["scale"], params["shift"],
      params["w2"], params["b2"])

    # (1, B) -> (B, 1): same linear layout, free reshape in the wrapper.
    return out.reshape(B, 1)


def init_params(key, embedding_dim=EMBEDDING_DIM, hidden_dim=HIDDEN_DIM):
    """Mirror nn.Linear defaults (uniform +-1/sqrt(fan_in)); weights stored
    already transposed (y = x @ W + b), stacked over the 5 encoders.
    w1/w2 are kept in bf16 (the fc matmuls run in bf16 with f32 accumulation)."""
    # TODO(synk): bf16 weight/activation quantization differs from the f32
    # PyTorch reference by ~1e-3 relative; confirm acceptable to model owner.
    keys = jax.random.split(key, 4 * NUM_ENCODERS)
    w1, b1, w2, b2 = [], [], [], []
    k = 0
    for _ in range(NUM_ENCODERS):
        bound1 = 1.0 / jnp.sqrt(embedding_dim)
        bound2 = 1.0 / jnp.sqrt(hidden_dim)
        w1.append(jax.random.uniform(keys[k], (embedding_dim, hidden_dim),
                                     jnp.float32, -bound1, bound1)); k += 1
        b1.append(jax.random.uniform(keys[k], (1, hidden_dim),
                                     jnp.float32, -bound1, bound1)); k += 1
        w2.append(jax.random.uniform(keys[k], (hidden_dim, hidden_dim),
                                     jnp.float32, -bound2, bound2)); k += 1
        b2.append(jax.random.uniform(keys[k], (1, hidden_dim),
                                     jnp.float32, -bound2, bound2)); k += 1
    return {
        "w1": jnp.stack(w1, axis=0).astype(jnp.bfloat16),  # (5, E, H) bf16
        "b1": jnp.stack(b1, axis=0),                       # (5, 1, H) f32
        "w2": jnp.stack(w2, axis=0).astype(jnp.bfloat16),  # (5, H, H) bf16
        "b2": jnp.stack(b2, axis=0),                       # (5, 1, H) f32
        "scale": jnp.ones((NUM_ENCODERS,), jnp.float32),   # nn.Parameter(ones(1))
        "shift": jnp.zeros((NUM_ENCODERS,), jnp.float32),  # nn.Parameter(zeros(1))
    }


def _reference_forward(embeddings, params):
    """Pure-JAX reference of the PyTorch forward, with the same bf16 operand
    dtypes as the kernel (f32 accumulation), so the comparison is tight."""
    encoded = []
    for i, e in enumerate(embeddings):
        x = e.astype(jnp.bfloat16)                                   # (B,1,E)
        h = jnp.matmul(x, params["w1"][i],
                       preferred_element_type=jnp.float32) + params["b1"][i]
        h = jax.nn.sigmoid(h) * params["scale"][i] + params["shift"][i]
        y = jnp.matmul(h.astype(jnp.bfloat16), params["w2"][i],
                       preferred_element_type=jnp.float32) + params["b2"][i]
        encoded.append(y)
    # PyTorch order: frame * agent_id * state * action * task
    q = encoded[0] * encoded[1] * encoded[2] * encoded[4] * encoded[3]
    q = q[:, 0, :]                         # squeeze(1)
    return jnp.mean(q, axis=1, keepdims=True)


def _run_case(B, params, key, atol=3e-5, rtol=2e-3):
    ikeys = jax.random.split(key, NUM_ENCODERS)
    # PyTorch-style inputs (B, 1, embedding_dim), produced directly in bf16 so
    # the kernel reads half the activation bytes (no standalone cast pass).
    embeddings = [
        jax.random.normal(ikeys[i], (B, 1, EMBEDDING_DIM),
                          jnp.float32).astype(jnp.bfloat16)
        for i in range(NUM_ENCODERS)
    ]
    out = jax.block_until_ready(rl_model_forward(*embeddings, params))
    ref = _reference_forward(embeddings, params)
    assert out.shape == (B, 1), out.shape
    assert jnp.all(jnp.isfinite(out)), "non-finite output"
    err = float(jnp.max(jnp.abs(out - ref)))
    assert jnp.allclose(out, ref, atol=atol, rtol=rtol), (B, err)
    return err


if __name__ == "__main__":
    key = jax.random.PRNGKey(0)
    pkey, ikey1, ikey2, skey = jax.random.split(key, 4)
    params = init_params(pkey)
    # non-trivial scale/shift so the affine path is actually exercised
    sk1, sk2 = jax.random.split(skey)
    params["scale"] = 1.0 + 0.1 * jax.random.normal(sk1, (NUM_ENCODERS,), jnp.float32)
    params["shift"] = 0.1 * jax.random.normal(sk2, (NUM_ENCODERS,), jnp.float32)

    # Small batch: single block, full-extent dims.
    _run_case(8, params, ikey1)
    # Large batch: multi-tile grid, ragged tail (masked (1,TB) writeback),
    # padded-row garbage confined to masked lanes.
    _run_case(1000, params, ikey2)

    print("KERNEL_OK")
</pallas_src>

<mosaic_0001>
module attributes {stable_mosaic.version = 11 : i64} {
  func.func @_rl_kernel(%arg0: i32, %arg1: memref<8x768xbf16, #tpu.memory_space<vmem>>, %arg2: memref<8x768xbf16, #tpu.memory_space<vmem>>, %arg3: memref<8x768xbf16, #tpu.memory_space<vmem>>, %arg4: memref<8x768xbf16, #tpu.memory_space<vmem>>, %arg5: memref<8x768xbf16, #tpu.memory_space<vmem>>, %arg6: memref<5x768x64xbf16, #tpu.memory_space<vmem>>, %arg7: memref<5x1x64xf32, #tpu.memory_space<vmem>>, %arg8: memref<5xf32, #tpu.memory_space<smem>>, %arg9: memref<5xf32, #tpu.memory_space<smem>>, %arg10: memref<5x64x64xbf16, #tpu.memory_space<vmem>>, %arg11: memref<5x1x64xf32, #tpu.memory_space<vmem>>, %arg12: memref<1x8xf32, #tpu.memory_space<vmem>>) attributes {dimension_semantics = [#tpu.dimension_semantics<parallel>], iteration_bounds = array<i64: 1>, scalar_prefetch = 0 : i64, scratch_operands = 0 : i64, tpu.core_type = #tpu.core_type<tc>, window_params = [{transform_indices = @transform_0, window_bounds = array<i64: 8, 768>}, {transform_indices = @transform_1, window_bounds = array<i64: 8, 768>}, {transform_indices = @transform_2, window_bounds = array<i64: 8, 768>}, {transform_indices = @transform_3, window_bounds = array<i64: 8, 768>}, {transform_indices = @transform_4, window_bounds = array<i64: 8, 768>}, {pipeline_mode = #tpu.pipeline_mode<synchronous>, transform_indices = @transform_5, window_bounds = array<i64: 5, 768, 64>}, {pipeline_mode = #tpu.pipeline_mode<synchronous>, transform_indices = @transform_6, window_bounds = array<i64: 5, 1, 64>}, {transform_indices = @transform_7, window_bounds = array<i64: 5>}, {transform_indices = @transform_8, window_bounds = array<i64: 5>}, {pipeline_mode = #tpu.pipeline_mode<synchronous>, transform_indices = @transform_9, window_bounds = array<i64: 5, 64, 64>}, {pipeline_mode = #tpu.pipeline_mode<synchronous>, transform_indices = @transform_10, window_bounds = array<i64: 5, 1, 64>}, {transform_indices = @transform_11, window_bounds = array<i64: 1, 8>}]} {
    %c0 = arith.constant 0 : index
    %c0_0 = arith.constant 0 : index
    %0 = vector.load %arg1[%c0, %c0_0] : memref<8x768xbf16, #tpu.memory_space<vmem>>, vector<8x768xbf16>
    %c0_1 = arith.constant 0 : index
    %c0_2 = arith.constant 0 : index
    %c0_3 = arith.constant 0 : index
    %1 = vector.load %arg6[%c0_1, %c0_2, %c0_3] : memref<5x768x64xbf16, #tpu.memory_space<vmem>>, vector<1x768x64xbf16>
    %2 = vector.shape_cast %1 : vector<1x768x64xbf16> to vector<768x64xbf16>
    %cst = arith.constant dense<0.000000e+00> : vector<8x64xf32>
    %3 = tpu.matmul %0, %2, %cst {dimension_numbers = #tpu.dot_dimension_numbers<[1], [0], [0], [1], [0, 0, 1, 1], [], []>} : vector<8x768xbf16>, vector<768x64xbf16>, vector<8x64xf32> -> vector<8x64xf32>
    %c0_4 = arith.constant 0 : index
    %c0_5 = arith.constant 0 : index
    %c0_6 = arith.constant 0 : index
    %4 = vector.load %arg7[%c0_4, %c0_5, %c0_6] : memref<5x1x64xf32, #tpu.memory_space<vmem>>, vector<1x1x64xf32>
    %5 = vector.shape_cast %4 : vector<1x1x64xf32> to vector<1x64xf32>
    %6 = vector.broadcast %5 : vector<1x64xf32> to vector<8x64xf32>
    %7 = arith.addf %3, %6 : vector<8x64xf32>
    %8 = arith.negf %7 : vector<8x64xf32>
    %9 = math.exp %8 : vector<8x64xf32>
    %cst_7 = arith.constant 1.000000e+00 : f32
    %10 = vector.broadcast %cst_7 : f32 to vector<8x64xf32>
    %11 = arith.addf %10, %9 : vector<8x64xf32>
    %12 = arith.divf %10, %11 : vector<8x64xf32>
    %c0_8 = arith.constant 0 : index
    %13 = memref.load %arg8[%c0_8] : memref<5xf32, #tpu.memory_space<smem>>
    %14 = vector.broadcast %13 : f32 to vector<8x64xf32>
    %15 = arith.mulf %12, %14 : vector<8x64xf32>
    %c0_9 = arith.constant 0 : index
    %16 = memref.load %arg9[%c0_9] : memref<5xf32, #tpu.memory_space<smem>>
    %17 = vector.broadcast %16 : f32 to vector<8x64xf32>
    %18 = arith.addf %15, %17 : vector<8x64xf32>
    %19 = arith.truncf %18 : vector<8x64xf32> to vector<8x64xbf16>
    %c0_10 = arith.constant 0 : index
    %c0_11 = arith.constant 0 : index
    %c0_12 = arith.constant 0 : index
    %20 = vector.load %arg10[%c0_10, %c0_11, %c0_12] : memref<5x64x64xbf16, #tpu.memory_space<vmem>>, vector<1x64x64xbf16>
    %21 = vector.shape_cast %20 : vector<1x64x64xbf16> to vector<64x64xbf16>
    %cst_13 = arith.constant dense<0.000000e+00> : vector<8x64xf32>
    %22 = tpu.matmul %19, %21, %cst_13 {dimension_numbers = #tpu.dot_dimension_numbers<[1], [0], [0], [1], [0, 0, 1, 1], [], []>} : vector<8x64xbf16>, vector<64x64xbf16>, vector<8x64xf32> -> vector<8x64xf32>
    %c0_14 = arith.constant 0 : index
    %c0_15 = arith.constant 0 : index
    %c0_16 = arith.constant 0 : index
    %23 = vector.load %arg11[%c0_14, %c0_15, %c0_16] : memref<5x1x64xf32, #tpu.memory_space<vmem>>, vector<1x1x64xf32>
    %24 = vector.shape_cast %23 : vector<1x1x64xf32> to vector<1x64xf32>
    %25 = vector.broadcast %24 : vector<1x64xf32> to vector<8x64xf32>
    %26 = arith.addf %22, %25 : vector<8x64xf32>
    %c0_17 = arith.constant 0 : index
    %c0_18 = arith.constant 0 : index
    %27 = vector.load %arg2[%c0_17, %c0_18] : memref<8x768xbf16, #tpu.memory_space<vmem>>, vector<8x768xbf16>
    %c1 = arith.constant 1 : index
    %c0_19 = arith.constant 0 : index
    %c0_20 = arith.constant 0 : index
    %28 = vector.load %arg6[%c1, %c0_19, %c0_20] : memref<5x768x64xbf16, #tpu.memory_space<vmem>>, vector<1x768x64xbf16>
    %29 = vector.shape_cast %28 : vector<1x768x64xbf16> to vector<768x64xbf16>
    %cst_21 = arith.constant dense<0.000000e+00> : vector<8x64xf32>
    %30 = tpu.matmul %27, %29, %cst_21 {dimension_numbers = #tpu.dot_dimension_numbers<[1], [0], [0], [1], [0, 0, 1, 1], [], []>} : vector<8x768xbf16>, vector<768x64xbf16>, vector<8x64xf32> -> vector<8x64xf32>
    %c1_22 = arith.constant 1 : index
    %c0_23 = arith.constant 0 : index
    %c0_24 = arith.constant 0 : index
    %31 = vector.load %arg7[%c1_22, %c0_23, %c0_24] : memref<5x1x64xf32, #tpu.memory_space<vmem>>, vector<1x1x64xf32>
    %32 = vector.shape_cast %31 : vector<1x1x64xf32> to vector<1x64xf32>
    %33 = vector.broadcast %32 : vector<1x64xf32> to vector<8x64xf32>
    %34 = arith.addf %30, %33 : vector<8x64xf32>
    %35 = arith.negf %34 : vector<8x64xf32>
    %36 = math.exp %35 : vector<8x64xf32>
    %cst_25 = arith.constant 1.000000e+00 : f32
    %37 = vector.broadcast %cst_25 : f32 to vector<8x64xf32>
    %38 = arith.addf %37, %36 : vector<8x64xf32>
    %39 = arith.divf %37, %38 : vector<8x64xf32>
    %c1_26 = arith.constant 1 : index
    %40 = memref.load %arg8[%c1_26] : memref<5xf32, #tpu.memory_space<smem>>
    %41 = vector.broadcast %40 : f32 to vector<8x64xf32>
    %42 = arith.mulf %39, %41 : vector<8x64xf32>
    %c1_27 = arith.constant 1 : index
    %43 = memref.load %arg9[%c1_27] : memref<5xf32, #tpu.memory_space<smem>>
    %44 = vector.broadcast %43 : f32 to vector<8x64xf32>
    %45 = arith.addf %42, %44 : vector<8x64xf32>
    %46 = arith.truncf %45 : vector<8x64xf32> to vector<8x64xbf16>
    %c1_28 = arith.constant 1 : index
    %c0_29 = arith.constant 0 : index
    %c0_30 = arith.constant 0 : index
    %47 = vector.load %arg10[%c1_28, %c0_29, %c0_30] : memref<5x64x64xbf16, #tpu.memory_space<vmem>>, vector<1x64x64xbf16>
    %48 = vector.shape_cast %47 : vector<1x64x64xbf16> to vector<64x64xbf16>
    %cst_31 = arith.constant dense<0.000000e+00> : vector<8x64xf32>
    %49 = tpu.matmul %46, %48, %cst_31 {dimension_numbers = #tpu.dot_dimension_numbers<[1], [0], [0], [1], [0, 0, 1, 1], [], []>} : vector<8x64xbf16>, vector<64x64xbf16>, vector<8x64xf32> -> vector<8x64xf32>
    %c1_32 = arith.constant 1 : index
    %c0_33 = arith.constant 0 : index
    %c0_34 = arith.constant 0 : index
    %50 = vector.load %arg11[%c1_32, %c0_33, %c0_34] : memref<5x1x64xf32, #tpu.memory_space<vmem>>, vector<1x1x64xf32>
    %51 = vector.shape_cast %50 : vector<1x1x64xf32> to vector<1x64xf32>
    %52 = vector.broadcast %51 : vector<1x64xf32> to vector<8x64xf32>
    %53 = arith.addf %49, %52 : vector<8x64xf32>
    %54 = arith.mulf %26, %53 : vector<8x64xf32>
    %c0_35 = arith.constant 0 : index
    %c0_36 = arith.constant 0 : index
    %55 = vector.load %arg3[%c0_35, %c0_36] : memref<8x768xbf16, #tpu.memory_space<vmem>>, vector<8x768xbf16>
    %c2 = arith.constant 2 : index
    %c0_37 = arith.constant 0 : index
    %c0_38 = arith.constant 0 : index
    %56 = vector.load %arg6[%c2, %c0_37, %c0_38] : memref<5x768x64xbf16, #tpu.memory_space<vmem>>, vector<1x768x64xbf16>
    %57 = vector.shape_cast %56 : vector<1x768x64xbf16> to vector<768x64xbf16>
    %cst_39 = arith.constant dense<0.000000e+00> : vector<8x64xf32>
    %58 = tpu.matmul %55, %57, %cst_39 {dimension_numbers = #tpu.dot_dimension_numbers<[1], [0], [0], [1], [0, 0, 1, 1], [], []>} : vector<8x768xbf16>, vector<768x64xbf16>, vector<8x64xf32> -> vector<8x64xf32>
    %c2_40 = arith.constant 2 : index
    %c0_41 = arith.constant 0 : index
    %c0_42 = arith.constant 0 : index
    %59 = vector.load %arg7[%c2_40, %c0_41, %c0_42] : memref<5x1x64xf32, #tpu.memory_space<vmem>>, vector<1x1x64xf32>
    %60 = vector.shape_cast %59 : vector<1x1x64xf32> to vector<1x64xf32>
    %61 = vector.broadcast %60 : vector<1x64xf32> to vector<8x64xf32>
    %62 = arith.addf %58, %61 : vector<8x64xf32>
    %63 = arith.negf %62 : vector<8x64xf32>
    %64 = math.exp %63 : vector<8x64xf32>
    %cst_43 = arith.constant 1.000000e+00 : f32
    %65 = vector.broadcast %cst_43 : f32 to vector<8x64xf32>
    %66 = arith.addf %65, %64 : vector<8x64xf32>
    %67 = arith.divf %65, %66 : vector<8x64xf32>
    %c2_44 = arith.constant 2 : index
    %68 = memref.load %arg8[%c2_44] : memref<5xf32, #tpu.memory_space<smem>>
    %69 = vector.broadcast %68 : f32 to vector<8x64xf32>
    %70 = arith.mulf %67, %69 : vector<8x64xf32>
    %c2_45 = arith.constant 2 : index
    %71 = memref.load %arg9[%c2_45] : memref<5xf32, #tpu.memory_space<smem>>
    %72 = vector.broadcast %71 : f32 to vector<8x64xf32>
    %73 = arith.addf %70, %72 : vector<8x64xf32>
    %74 = arith.truncf %73 : vector<8x64xf32> to vector<8x64xbf16>
    %c2_46 = arith.constant 2 : index
    %c0_47 = arith.constant 0 : index
    %c0_48 = arith.constant 0 : index
    %75 = vector.load %arg10[%c2_46, %c0_47, %c0_48] : memref<5x64x64xbf16, #tpu.memory_space<vmem>>, vector<1x64x64xbf16>
    %76 = vector.shape_cast %75 : vector<1x64x64xbf16> to vector<64x64xbf16>
    %cst_49 = arith.constant dense<0.000000e+00> : vector<8x64xf32>
    %77 = tpu.matmul %74, %76, %cst_49 {dimension_numbers = #tpu.dot_dimension_numbers<[1], [0], [0], [1], [0, 0, 1, 1], [], []>} : vector<8x64xbf16>, vector<64x64xbf16>, vector<8x64xf32> -> vector<8x64xf32>
    %c2_50 = arith.constant 2 : index
    %c0_51 = arith.constant 0 : index
    %c0_52 = arith.constant 0 : index
    %78 = vector.load %arg11[%c2_50, %c0_51, %c0_52] : memref<5x1x64xf32, #tpu.memory_space<vmem>>, vector<1x1x64xf32>
    %79 = vector.shape_cast %78 : vector<1x1x64xf32> to vector<1x64xf32>
    %80 = vector.broadcast %79 : vector<1x64xf32> to vector<8x64xf32>
    %81 = arith.addf %77, %80 : vector<8x64xf32>
    %82 = arith.mulf %54, %81 : vector<8x64xf32>
    %c0_53 = arith.constant 0 : index
    %c0_54 = arith.constant 0 : index
    %83 = vector.load %arg5[%c0_53, %c0_54] : memref<8x768xbf16, #tpu.memory_space<vmem>>, vector<8x768xbf16>
    %c4 = arith.constant 4 : index
    %c0_55 = arith.constant 0 : index
    %c0_56 = arith.constant 0 : index
    %84 = vector.load %arg6[%c4, %c0_55, %c0_56] : memref<5x768x64xbf16, #tpu.memory_space<vmem>>, vector<1x768x64xbf16>
    %85 = vector.shape_cast %84 : vector<1x768x64xbf16> to vector<768x64xbf16>
    %cst_57 = arith.constant dense<0.000000e+00> : vector<8x64xf32>
    %86 = tpu.matmul %83, %85, %cst_57 {dimension_numbers = #tpu.dot_dimension_numbers<[1], [0], [0], [1], [0, 0, 1, 1], [], []>} : vector<8x768xbf16>, vector<768x64xbf16>, vector<8x64xf32> -> vector<8x64xf32>
    %c4_58 = arith.constant 4 : index
    %c0_59 = arith.constant 0 : index
    %c0_60 = arith.constant 0 : index
    %87 = vector.load %arg7[%c4_58, %c0_59, %c0_60] : memref<5x1x64xf32, #tpu.memory_space<vmem>>, vector<1x1x64xf32>
    %88 = vector.shape_cast %87 : vector<1x1x64xf32> to vector<1x64xf32>
    %89 = vector.broadcast %88 : vector<1x64xf32> to vector<8x64xf32>
    %90 = arith.addf %86, %89 : vector<8x64xf32>
    %91 = arith.negf %90 : vector<8x64xf32>
    %92 = math.exp %91 : vector<8x64xf32>
    %cst_61 = arith.constant 1.000000e+00 : f32
    %93 = vector.broadcast %cst_61 : f32 to vector<8x64xf32>
    %94 = arith.addf %93, %92 : vector<8x64xf32>
    %95 = arith.divf %93, %94 : vector<8x64xf32>
    %c4_62 = arith.constant 4 : index
    %96 = memref.load %arg8[%c4_62] : memref<5xf32, #tpu.memory_space<smem>>
    %97 = vector.broadcast %96 : f32 to vector<8x64xf32>
    %98 = arith.mulf %95, %97 : vector<8x64xf32>
    %c4_63 = arith.constant 4 : index
    %99 = memref.load %arg9[%c4_63] : memref<5xf32, #tpu.memory_space<smem>>
    %100 = vector.broadcast %99 : f32 to vector<8x64xf32>
    %101 = arith.addf %98, %100 : vector<8x64xf32>
    %102 = arith.truncf %101 : vector<8x64xf32> to vector<8x64xbf16>
    %c4_64 = arith.constant 4 : index
    %c0_65 = arith.constant 0 : index
    %c0_66 = arith.constant 0 : index
    %103 = vector.load %arg10[%c4_64, %c0_65, %c0_66] : memref<5x64x64xbf16, #tpu.memory_space<vmem>>, vector<1x64x64xbf16>
    %104 = vector.shape_cast %103 : vector<1x64x64xbf16> to vector<64x64xbf16>
    %cst_67 = arith.constant dense<0.000000e+00> : vector<8x64xf32>
    %105 = tpu.matmul %102, %104, %cst_67 {dimension_numbers = #tpu.dot_dimension_numbers<[1], [0], [0], [1], [0, 0, 1, 1], [], []>} : vector<8x64xbf16>, vector<64x64xbf16>, vector<8x64xf32> -> vector<8x64xf32>
    %c4_68 = arith.constant 4 : index
    %c0_69 = arith.constant 0 : index
    %c0_70 = arith.constant 0 : index
    %106 = vector.load %arg11[%c4_68, %c0_69, %c0_70] : memref<5x1x64xf32, #tpu.memory_space<vmem>>, vector<1x1x64xf32>
    %107 = vector.shape_cast %106 : vector<1x1x64xf32> to vector<1x64xf32>
    %108 = vector.broadcast %107 : vector<1x64xf32> to vector<8x64xf32>
    %109 = arith.addf %105, %108 : vector<8x64xf32>
    %110 = arith.mulf %82, %109 : vector<8x64xf32>
    %c0_71 = arith.constant 0 : index
    %c0_72 = arith.constant 0 : index
    %111 = vector.load %arg4[%c0_71, %c0_72] : memref<8x768xbf16, #tpu.memory_space<vmem>>, vector<8x768xbf16>
    %c3 = arith.constant 3 : index
    %c0_73 = arith.constant 0 : index
    %c0_74 = arith.constant 0 : index
    %112 = vector.load %arg6[%c3, %c0_73, %c0_74] : memref<5x768x64xbf16, #tpu.memory_space<vmem>>, vector<1x768x64xbf16>
    %113 = vector.shape_cast %112 : vector<1x768x64xbf16> to vector<768x64xbf16>
    %cst_75 = arith.constant dense<0.000000e+00> : vector<8x64xf32>
    %114 = tpu.matmul %111, %113, %cst_75 {dimension_numbers = #tpu.dot_dimension_numbers<[1], [0], [0], [1], [0, 0, 1, 1], [], []>} : vector<8x768xbf16>, vector<768x64xbf16>, vector<8x64xf32> -> vector<8x64xf32>
    %c3_76 = arith.constant 3 : index
    %c0_77 = arith.constant 0 : index
    %c0_78 = arith.constant 0 : index
    %115 = vector.load %arg7[%c3_76, %c0_77, %c0_78] : memref<5x1x64xf32, #tpu.memory_space<vmem>>, vector<1x1x64xf32>
    %116 = vector.shape_cast %115 : vector<1x1x64xf32> to vector<1x64xf32>
    %117 = vector.broadcast %116 : vector<1x64xf32> to vector<8x64xf32>
    %118 = arith.addf %114, %117 : vector<8x64xf32>
    %119 = arith.negf %118 : vector<8x64xf32>
    %120 = math.exp %119 : vector<8x64xf32>
    %cst_79 = arith.constant 1.000000e+00 : f32
    %121 = vector.broadcast %cst_79 : f32 to vector<8x64xf32>
    %122 = arith.addf %121, %120 : vector<8x64xf32>
    %123 = arith.divf %121, %122 : vector<8x64xf32>
    %c3_80 = arith.constant 3 : index
    %124 = memref.load %arg8[%c3_80] : memref<5xf32, #tpu.memory_space<smem>>
    %125 = vector.broadcast %124 : f32 to vector<8x64xf32>
    %126 = arith.mulf %123, %125 : vector<8x64xf32>
    %c3_81 = arith.constant 3 : index
    %127 = memref.load %arg9[%c3_81] : memref<5xf32, #tpu.memory_space<smem>>
    %128 = vector.broadcast %127 : f32 to vector<8x64xf32>
    %129 = arith.addf %126, %128 : vector<8x64xf32>
    %130 = arith.truncf %129 : vector<8x64xf32> to vector<8x64xbf16>
    %c3_82 = arith.constant 3 : index
    %c0_83 = arith.constant 0 : index
    %c0_84 = arith.constant 0 : index
    %131 = vector.load %arg10[%c3_82, %c0_83, %c0_84] : memref<5x64x64xbf16, #tpu.memory_space<vmem>>, vector<1x64x64xbf16>
    %132 = vector.shape_cast %131 : vector<1x64x64xbf16> to vector<64x64xbf16>
    %cst_85 = arith.constant dense<0.000000e+00> : vector<8x64xf32>
    %133 = tpu.matmul %130, %132, %cst_85 {dimension_numbers = #tpu.dot_dimension_numbers<[1], [0], [0], [1], [0, 0, 1, 1], [], []>} : vector<8x64xbf16>, vector<64x64xbf16>, vector<8x64xf32> -> vector<8x64xf32>
    %c3_86 = arith.constant 3 : index
    %c0_87 = arith.constant 0 : index
    %c0_88 = arith.constant 0 : index
    %134 = vector.load %arg11[%c3_86, %c0_87, %c0_88] : memref<5x1x64xf32, #tpu.memory_space<vmem>>, vector<1x1x64xf32>
    %135 = vector.shape_cast %134 : vector<1x1x64xf32> to vector<1x64xf32>
    %136 = vector.broadcast %135 : vector<1x64xf32> to vector<8x64xf32>
    %137 = arith.addf %133, %136 : vector<8x64xf32>
    %138 = arith.mulf %110, %137 : vector<8x64xf32>
    %cst_89 = arith.constant 1.562500e-02 : f32
    %139 = vector.broadcast %cst_89 : f32 to vector<1x64xf32>
    %cst_90 = arith.constant dense<0.000000e+00> : vector<1x8xf32>
    %140 = tpu.matmul %139, %138, %cst_90 {dimension_numbers = #tpu.dot_dimension_numbers<[1], [1], [0], [0], [0, 0, 1, 0], [], []>} : vector<1x64xf32>, vector<8x64xf32>, vector<1x8xf32> -> vector<1x8xf32>
    %c0_91 = arith.constant 0 : index
    %c0_92 = arith.constant 0 : index
    %141 = vector.load %arg12[%c0_91, %c0_92] : memref<1x8xf32, #tpu.memory_space<vmem>>, vector<1x8xf32>
    tpu.vector_store %arg12[%c0_91, %c0_92], %140 {strides = array<i32>} : memref<1x8xf32, #tpu.memory_space<vmem>>, vector<1x8xf32>,
    return
  }
  func.func @transform_0(%arg0: i32) -> (i32, i32) {
    %c0_i32 = arith.constant 0 : i32
    %c0_i32_0 = arith.constant 0 : i32
    return %arg0, %c0_i32 : i32, i32
  }
  func.func @transform_1(%arg0: i32) -> (i32, i32) {
    %c0_i32 = arith.constant 0 : i32
    %c0_i32_0 = arith.constant 0 : i32
    return %arg0, %c0_i32 : i32, i32
  }
  func.func @transform_2(%arg0: i32) -> (i32, i32) {
    %c0_i32 = arith.constant 0 : i32
    %c0_i32_0 = arith.constant 0 : i32
    return %arg0, %c0_i32 : i32, i32
  }
  func.func @transform_3(%arg0: i32) -> (i32, i32) {
    %c0_i32 = arith.constant 0 : i32
    %c0_i32_0 = arith.constant 0 : i32
    return %arg0, %c0_i32 : i32, i32
  }
  func.func @transform_4(%arg0: i32) -> (i32, i32) {
    %c0_i32 = arith.constant 0 : i32
    %c0_i32_0 = arith.constant 0 : i32
    return %arg0, %c0_i32 : i32, i32
  }
  func.func @transform_5(%arg0: i32) -> (i32, i32, i32) {
    %c0_i32 = arith.constant 0 : i32
    %c0_i32_0 = arith.constant 0 : i32
    %c0_i32_1 = arith.constant 0 : i32
    %c0_i32_2 = arith.constant 0 : i32
    return %c0_i32, %c0_i32_0, %c0_i32_1 : i32, i32, i32
  }
  func.func @transform_6(%arg0: i32) -> (i32, i32, i32) {
    %c0_i32 = arith.constant 0 : i32
    %c0_i32_0 = arith.constant 0 : i32
    %c0_i32_1 = arith.constant 0 : i32
    %c0_i32_2 = arith.constant 0 : i32
    return %c0_i32, %c0_i32_0, %c0_i32_1 : i32, i32, i32
  }
  func.func @transform_7(%arg0: i32) -> i32 {
    %c0_i32 = arith.constant 0 : i32
    %c0_i32_0 = arith.constant 0 : i32
    return %c0_i32 : i32
  }
  func.func @transform_8(%arg0: i32) -> i32 {
    %c0_i32 = arith.constant 0 : i32
    %c0_i32_0 = arith.constant 0 : i32
    return %c0_i32 : i32
  }
  func.func @transform_9(%arg0: i32) -> (i32, i32, i32) {
    %c0_i32 = arith.constant 0 : i32
    %c0_i32_0 = arith.constant 0 : i32
    %c0_i32_1 = arith.constant 0 : i32
    %c0_i32_2 = arith.constant 0 : i32
    return %c0_i32, %c0_i32_0, %c0_i32_1 : i32, i32, i32
  }
  func.func @transform_10(%arg0: i32) -> (i32, i32, i32) {
    %c0_i32 = arith.constant 0 : i32
    %c0_i32_0 = arith.constant 0 : i32
    %c0_i32_1 = arith.constant 0 : i32
    %c0_i32_2 = arith.constant 0 : i32
    return %c0_i32, %c0_i32_0, %c0_i32_1 : i32, i32, i32
  }
  func.func @transform_11(%arg0: i32) -> (i32, i32) {
    %c0_i32 = arith.constant 0 : i32
    %c0_i32_0 = arith.constant 0 : i32
    return %c0_i32, %arg0 : i32, i32
  }
}

</mosaic_0001>

<bundles_post_ra>
// kernel: tpu_custom_call.1
= control target key start
LH: loop header
LB: loop body
LE: loop exit
PB: predicated region body
PF: predicated region fallthrough
CT: control target
= control target key end

     0   :  { %16 = vsyncpa [#allocation4], 0  ;;  %s5850_s0 = inlined_call_operand.vmem [shape: bf16[8,768], index: 0, kind: input, shape index: {}]   ;;  %s5851_s1 = inlined_call_operand.vmem [shape: bf16[8,768], index: 1, kind: input, shape index: {}]   ;;  %s5852_s2 = inlined_call_operand.vmem [shape: bf16[8,768], index: 2, kind: input, shape index: {}]   ;;  %s5853_s3 = inlined_call_operand.vmem [shape: bf16[8,768], index: 3, kind: input, shape index: {}]   ;;  %s5854_s4 = inlined_call_operand.vmem [shape: bf16[8,768], index: 4, kind: input, shape index: {}]   ;;  %s5855_s5 = inlined_call_operand.vmem [shape: bf16[5,768,64], index: 5, kind: input, shape index: {}]   ;;  %s5856_s6 = inlined_call_operand.vmem [shape: f32[5,1,64], index: 6, kind: input, shape index: {}]   ;;  %s5857_s7 = inlined_call_operand.vmem [shape: f32[5], index: 7, kind: input, shape index: {}]   ;;  %s5858_s8 = inlined_call_operand.vmem [shape: f32[5], index: 8, kind: input, shape index: {}]   ;;  %s5859_s9 = inlined_call_operand.vmem [shape: bf16[5,64,64], index: 9, kind: input, shape index: {}]   ;;  %s5860_s10 = inlined_call_operand.vmem [shape: f32[5,1,64], index: 10, kind: input, shape index: {}]   ;;  %s5861_s11 = inlined_call_operand.hbm [shape: f32[1,8], index: 11, kind: output, shape index: {}]  }
   0x1   :  { %17 = vsyncpa [#allocation6], 0 }
   0x2   :  { %18 = vsyncpa [#allocation3], 0  ;;  %s39_s19 = sshll.u32 %s5857_s7, 4  ;;  %s49_s22 = sshll.u32 %s5858_s8, 4  ;;  %s40_s19 = int_to_ptr.vmem [resolvable:$true] %s39_s19  ;;  %s50_s22 = int_to_ptr.vmem [resolvable:$true] %s49_s22 }
   0x3   :  { %s4812_s23 = scalar_lea.vmem %s40_s19, 16  ;;  %p4817_p1 = scmp.lt.s32.totalorder %s40_s19, %s40_s19 }
   0x4   :  { %p4813_p0 = scmp.ne.s32.totalorder %s40_s19, %s4812_s23  ;;  %p4818_p2 = scmp.lt.s32.totalorder %s4812_s23, %s4812_s23 }
   0x6   :  { %p4819_p3 = por %p4818_p2, %p4817_p1 }
   0x8   :  { %p4820_p4 = pnand %p4819_p3, %p4813_p0 }
   0xa   :  { %4823 = shalt.err (!%p4820_p4)
}
   0xb   :  { %s4862_s24 = smov [#allocation2]   ;;  %s4824_s25 = scalar_lea.vmem %s50_s22, 16 }
   0xc   :  { %42 = dma.vmem_to_smem %s40_s19, 16, %s4862_s24, [#allocation4]  }
   0xd   :  { %p4825_p5 = scmp.ne.s32.totalorder %s50_s22, %s4824_s25  ;;  %p4829_p6 = scmp.lt.s32.totalorder %s50_s22, %s50_s22 }
   0xe   :  { %p4830_p7 = scmp.lt.s32.totalorder %s4824_s25, %s4824_s25 }
  0x10   :  { %p4831_p8 = por %p4830_p7, %p4829_p6 }
  0x12   :  { %p4832_p9 = pnand %p4831_p8, %p4825_p5 }
  0x14   :  { %4835 = shalt.err (!%p4832_p9)
}
  0x15   :  { %s4863_s7 = smov [#allocation5]  }
  0x16   :  { %52 = dma.vmem_to_smem %s50_s22, 16, %s4863_s7, [#allocation6]  }
  0x17   :  { %4856 = dma.done.wait [#allocation4], 16  }
  0x18   :  { %4857 = vsyncadd [#allocation4], 4294967280 }
  0x19   :  { %4858 = dma.done.wait [#allocation6], 16  }
  0x1a   :  { %4859 = vsyncadd [#allocation6], 4294967280 }
  0x1b   :  { %63 = sfence }
  0x1c   :  { %v4502_v0 = vld [vmem:[%s5855_s5 + $0x78] sm:$0xff]   ;;  %v4506_v4 = vld [vmem:[%s5855_s5 + $0x70] sm:$0xff]   ;;  %v4510_v8 = vld [vmem:[%s5855_s5 + $0x68] sm:$0xff]   ;;  %v4864_v58 = vmov 0.0   ;;  %vm4865_vm0 = vmmov 0   ;;  %s606_s25 = sld [smem:[#allocation2]] }
  0x1d   :  { %v4503_v1 = vld [vmem:[%s5855_s5 + $0x38] sm:$0xff]   ;;  %4074 = vmatprep.subr.bf16.mxu0 %v4502_v0  ;;  %v4507_v5 = vld [vmem:[%s5855_s5 + $0x30] sm:$0xff]   ;;  %v4511_v9 = vld [vmem:[%s5855_s5 + $0x28] sm:$0xff]   ;;  %s609_s7 = sld [smem:[#allocation5]]  ;;  %vm652_vm1 = vcmask 523264   ;;  %s4867_s22 = smov [#allocation7]  }
  0x1e   :  { %v4504_v2 = vld [vmem:[%s5855_s5 + $0xf8] sm:$0xff]   ;;  %4075 = vmatpush3.bf16.msra.mxu0 %v4503_v1  ;;  %v4508_v6 = vld [vmem:[%s5855_s5 + $0xf0] sm:$0xff]   ;;  %v4512_v10 = vld [vmem:[%s5855_s5 + $0xe8] sm:$0xff]   ;;  %s3885_s20 = sld [smem:[#allocation2 + $0x4]]  ;;  %s3320_s23 = sshll.u32 %s4867_s22, 4  ;;  %vm3312_vm2 = vcmask 57344   ;;  %s3321_s23 = int_to_ptr.vmem [resolvable:$true] %s3320_s23 }
  0x1f   :  { %v4505_v3 = vld [vmem:[%s5855_s5 + $0xb8] sm:$0xff]   ;;  %4096 = vmatprep.subr.bf16.mxu1 %v4504_v2  ;;  %4076 = vmatprep.subr.bf16.mxu0 %v4506_v4  ;;  %v4509_v7 = vld [vmem:[%s5855_s5 + $0xb0] sm:$0xff]   ;;  %v4513_v11 = vld [vmem:[%s5855_s5 + $0xa8] sm:$0xff]   ;;  %s3886_s21 = sld [smem:[#allocation5 + $0x4]]  ;;  %p4841_p11 = scmp.lt.s32.totalorder %s3321_s23, %s3321_s23 }
  0x20   :  { %4097 = vmatpush3.bf16.msra.mxu1 %v4505_v3  ;;  %v4514_v12 = vld [vmem:[%s5855_s5 + $0x60] sm:$0xff]   ;;  %v4518_v16 = vld [vmem:[%s5855_s5 + $0x58] sm:$0xff]   ;;  %v4522_v20 = vld [vmem:[%s5855_s5 + $0x50] sm:$0xff]  }
  0x21   :  { %4098 = vmatprep.subr.bf16.mxu1 %v4508_v6  ;;  %v4515_v13 = vld [vmem:[%s5855_s5 + $0x20] sm:$0xff]   ;;  %v4519_v17 = vld [vmem:[%s5855_s5 + $0x18] sm:$0xff]   ;;  %v4523_v21 = vld [vmem:[%s5855_s5 + $0x10] sm:$0xff]  }
  0x22   :  { %4077 = vmatpush3.bf16.msra.mxu0 %v4507_v5  ;;  %v4516_v14 = vld [vmem:[%s5855_s5 + $0xe0] sm:$0xff]   ;;  %v4520_v18 = vld [vmem:[%s5855_s5 + $0xd8] sm:$0xff]   ;;  %v4524_v22 = vld [vmem:[%s5855_s5 + $0xd0] sm:$0xff]  }
  0x23   :  { %4078 = vmatprep.subr.bf16.mxu0 %v4510_v8  ;;  %v4517_v15 = vld [vmem:[%s5855_s5 + $0xa0] sm:$0xff]   ;;  %v4521_v19 = vld [vmem:[%s5855_s5 + $0x98] sm:$0xff]   ;;  %v4525_v23 = vld [vmem:[%s5855_s5 + $0x90] sm:$0xff]  }
  0x24   :  { %4099 = vmatpush3.bf16.msra.mxu1 %v4509_v7  ;;  %v4526_v24 = vld [vmem:[%s5855_s5 + $0x48] sm:$0xff]   ;;  %v4530_v28 = vld [vmem:[%s5855_s5 + $0x40] sm:$0xff]   ;;  %v4536_v35 = vld [vmem:[%s5855_s5 + $0x178] sm:$0xff]  }
  0x25   :  { %4100 = vmatprep.subr.bf16.mxu1 %v4512_v10  ;;  %v4527_v25 = vld [vmem:[%s5855_s5 + $0x8] sm:$0xff]   ;;  %v4531_v29 = vld [vmem:[%s5855_s5] sm:$0xff]   ;;  %v4539_v39 = vld [vmem:[%s5855_s5 + $0x138] sm:$0xff]  }
  0x26   :  { %4079 = vmatpush3.bf16.msra.mxu0 %v4511_v9  ;;  %v4528_v26 = vld [vmem:[%s5855_s5 + $0xc8] sm:$0xff]   ;;  %v4532_v30 = vld [vmem:[%s5855_s5 + $0xc0] sm:$0xff]   ;;  %v4540_v40 = vld [vmem:[%s5855_s5 + $0x170] sm:$0xff]  }
  0x27   :  { %4080 = vmatprep.subr.bf16.mxu0 %v4514_v12  ;;  %v4529_v27 = vld [vmem:[%s5855_s5 + $0x88] sm:$0xff]   ;;  %v65_v31 = vld [vmem:[%s5850_s0] sm:$0xff]  ;;  %v4541_v41 = vld [vmem:[%s5855_s5 + $0x130] sm:$0xff]  }
  0x28   :  { %4101 = vmatpush3.bf16.msra.mxu1 %v4513_v11  ;;  %v3331_v32 = vcombine.low %v65_v31, %v65_v31  ;;  %v3332_v33 = vcombine.high %v65_v31, %v65_v31  ;;  %v4535_v34 = vld [vmem:[%s5855_s5 + $0x80] sm:$0xff]   ;;  %v66_v36 = vld [vmem:[%s5850_s0 + $0x8] sm:$0xff]  ;;  %v4546_v46 = vld [vmem:[%s5855_s5 + $0x158] sm:$0xff]  }
  0x29   :  { %4102 = vmatprep.subr.bf16.mxu1 %v4516_v14  ;;  %v3333_v37 = vcombine.low %v66_v36, %v66_v36  ;;  %v3334_v38 = vcombine.high %v66_v36, %v66_v36  ;;  %v4542_v42 = vld [vmem:[%s5855_s5 + $0x168] sm:$0xff]   ;;  %v4544_v44 = vld [vmem:[%s5855_s5 + $0x160] sm:$0xff]   ;;  %v4547_v47 = vld [vmem:[%s5855_s5 + $0x118] sm:$0xff]  }
  0x2a   :  { %4081 = vmatpush3.bf16.msra.mxu0 %v4515_v13  ;;  %512 = vmatprep.mubr.bf16.mxu0 %v3332_v33  ;;  %v4543_v43 = vld [vmem:[%s5855_s5 + $0x128] sm:$0xff]   ;;  %v4545_v45 = vld [vmem:[%s5855_s5 + $0x120] sm:$0xff]   ;;  %v4548_v48 = vld [vmem:[%s5855_s5 + $0x150] sm:$0xff]  }
  0x2b   :  { %4082 = vmatprep.subr.bf16.mxu0 %v4518_v16  ;;  %552 = vmatprep.mubr.bf16.mxu1 %v3334_v38  ;;  %v67_v49 = vld [vmem:[%s5850_s0 + $0x10] sm:$0xff]  ;;  %v4550_v52 = vld [vmem:[%s5855_s5 + $0x148] sm:$0xff]   ;;  %v4552_v54 = vld [vmem:[%s5855_s5 + $0x140] sm:$0xff]   ;;  %s4056_s0 = sld [smem:[#allocation5 + $0x3]] }
  0x2c   :  { %4103 = vmatpush3.bf16.msra.mxu1 %v4517_v15  ;;  %v3336_v50 = vcombine.high %v67_v49, %v67_v49  ;;  %v4549_v51 = vld [vmem:[%s5855_s5 + $0x110] sm:$0xff]   ;;  %v4551_v53 = vld [vmem:[%s5855_s5 + $0x108] sm:$0xff]   ;;  %v4553_v55 = vld [vmem:[%s5855_s5 + $0x100] sm:$0xff]   ;;  %v3335_v56 = vcombine.low %v67_v49, %v67_v49 }
  0x2d   :  { %4104 = vmatprep.subr.bf16.mxu1 %v4520_v18  ;;  %v4556_v57 = vld [vmem:[%s5859_s9 + $0x18] sm:$0xff]   ;;  %v4557_v59 = vld [vmem:[%s5859_s9 + $0x10] sm:$0xff]   ;;  %v4558_v60 = vld [vmem:[%s5859_s9 + $0x8] sm:$0xff]  }
  0x2e   :  { %4083 = vmatpush3.bf16.msra.mxu0 %v4519_v17  ;;  %v4559_v61 = vld [vmem:[%s5859_s9] sm:$0xff]   ;;  %v4560_v62 = vld [vmem:[%s5855_s5 + $0x1f8] sm:$0xff]   ;;  %v4566_v1 = vld [vmem:[%s5855_s5 + $0x270] sm:$0xff]  }
  0x2f   :  { %4084 = vmatprep.subr.bf16.mxu0 %v4522_v20  ;;  %v4562_v63 = vld [vmem:[%s5855_s5 + $0x278] sm:$0xff]   ;;  %v4567_v2 = vld [vmem:[%s5855_s5 + $0x230] sm:$0xff]   ;;  %v4570_v3 = vld [vmem:[%s5855_s5 + $0x268] sm:$0xff]  }
  0x30   :  { %4105 = vmatpush3.bf16.msra.mxu1 %v4521_v19  ;;  %v4563_v0 = vld [vmem:[%s5855_s5 + $0x238] sm:$0xff]   ;;  %v4571_v4 = vld [vmem:[%s5855_s5 + $0x228] sm:$0xff]   ;;  %v4574_v5 = vld [vmem:[%s5855_s5 + $0x260] sm:$0xff]  }
  0x31   :  { %4106 = vmatprep.subr.bf16.mxu1 %v4524_v22  ;;  %v4575_v6 = vld [vmem:[%s5855_s5 + $0x220] sm:$0xff]   ;;  %v4578_v7 = vld [vmem:[%s5855_s5 + $0x258] sm:$0xff]   ;;  %v4582_v9 = vld [vmem:[%s5855_s5 + $0x250] sm:$0xff]  }
  0x32   :  { %4085 = vmatpush3.bf16.msra.mxu0 %v4523_v21  ;;  %v4579_v8 = vld [vmem:[%s5855_s5 + $0x218] sm:$0xff]   ;;  %v4583_v10 = vld [vmem:[%s5855_s5 + $0x210] sm:$0xff]   ;;  %v4586_v11 = vld [vmem:[%s5855_s5 + $0x248] sm:$0xff]  }
  0x33   :  { %4086 = vmatprep.subr.bf16.mxu0 %v4526_v24  ;;  %v4587_v12 = vld [vmem:[%s5855_s5 + $0x208] sm:$0xff]   ;;  %v4590_v13 = vld [vmem:[%s5855_s5 + $0x240] sm:$0xff]   ;;  %v4564_v49 = vld [vmem:[%s5855_s5 + $0x1f0] sm:$0xff]  }
  0x34   :  { %4107 = vmatpush3.bf16.msra.mxu1 %v4525_v23  ;;  %v4593_v14 = vld [vmem:[%s5855_s5 + $0x200] sm:$0xff]   ;;  %v697_v15 = vld [vmem:[%s5851_s1 + $0x8] sm:$0xff] }
  0x35   :  { %4108 = vmatprep.subr.bf16.mxu1 %v4528_v26  ;;  %v3493_v16 = vcombine.high %v697_v15, %v697_v15  ;;  %v3492_v17 = vcombine.low %v697_v15, %v697_v15  ;;  %v4608_v15 = vld [vmem:[%s5855_s5 + $0x2c8] sm:$0xff]  }
  0x36   :  { %4087 = vmatpush3.bf16.msra.mxu0 %v4527_v25 }
  0x37   :  { %4088 = vmatprep.subr.bf16.mxu0 %v4530_v28 }
  0x38   :  { %4109 = vmatpush3.bf16.msra.mxu1 %v4529_v27  ;;  %v3330_v27 = vld [vmem:[%s5856_s6] ss:$0 sm:$0xff] }
  0x39   :  { %4110 = vmatprep.subr.bf16.mxu1 %v4532_v30 }
  0x3a   :  { %4089 = vmatpush3.bf16.msra.mxu0 %v4531_v29 }
  0x3b   :  { %4118 = vmatprep.subr.bf16.mxu0 %v4536_v35 }
  0x3c   :  { %4111 = vmatpush3.bf16.msra.mxu1 %v4535_v34 }
  0x3d   :  { %513 = vmatmul.mubr.bf16.vlgmr.msra.gmra.mxu0 %v3331_v32  ;;  %4431 = vmatprep.subr.bf16.mxu1 %v4864_v58 }
  0x3e   :  { %4119 = vmatpush3.bf16.msra.mxu0 %v4539_v39  ;;  %592 = vmatprep.mubr.bf16.mxu0 %v3336_v50  ;;  %v4565_v50 = vld [vmem:[%s5855_s5 + $0x1b0] sm:$0xff]  }
  0x3f   :  { %553 = vmatmul.mubr.bf16.vlgmr.msra.gmra.mxu1 %v3333_v37  ;;  %4120 = vmatprep.subr.bf16.mxu0 %v4540_v40  ;;  %v607_v40 = vstv %s606_s25  ;;  %s3545_s25 = sld [smem:[#allocation2 + $0x1]] }
  0x40   :  { %4439 = vmatprep.mubr.msk.bf16.mxu1 %vm4865_vm0, %v4864_v58  ;;  %4432 = vmatpush3.bf16.msra.mxu1 %v4556_v57  ;;  %v4580_v57 = vld [vmem:[%s5855_s5 + $0x1d0] sm:$0xff]  }
  0x41   :  { %4433 = vmatprep.subr.bf16.mxu1 %v4864_v58 }
  0x42   :  { %4121 = vmatpush3.bf16.msra.mxu0 %v4541_v41 }
  0x43   :  { %4122 = vmatprep.subr.bf16.mxu0 %v4542_v42  ;;  %v610_v42 = vstv %s609_s7  ;;  %s3546_s7 = sld [smem:[#allocation5 + $0x1]] }
  0x44   :  { %4434 = vmatpush3.bf16.msra.mxu1 %v4557_v59  ;;  %v4581_v59 = vld [vmem:[%s5855_s5 + $0x190] sm:$0xff]  }
  0x45   :  { %4435 = vmatprep.subr.bf16.mxu1 %v4864_v58 }
  0x46   :  { %4123 = vmatpush3.bf16.msra.mxu0 %v4543_v43 }
  0x47   :  { %4124 = vmatprep.subr.bf16.mxu0 %v4544_v44  ;;  %v696_v44 = vld [vmem:[%s5851_s1] sm:$0xff] }
  0x48   :  { %4436 = vmatpush3.bf16.msra.mxu1 %v4558_v60  ;;  %v4584_v60 = vld [vmem:[%s5855_s5 + $0x1c8] sm:$0xff]  }
  0x49   :  { %4437 = vmatprep.subr.bf16.mxu1 %v4864_v58 }
  0x4a   :  { %4125 = vmatpush3.bf16.msra.mxu0 %v4545_v45 }
  0x4b   :  { %4126 = vmatprep.subr.bf16.mxu0 %v4546_v46  ;;  %v4561_v46 = vld [vmem:[%s5855_s5 + $0x1b8] sm:$0xff]  }
  0x4c   :  { %4438 = vmatpush3.bf16.msra.mxu1 %v4559_v61  ;;  %v4585_v61 = vld [vmem:[%s5855_s5 + $0x188] sm:$0xff]  }
  0x4d   :  { %4145 = vmatprep.subr.bf16.mxu1 %v4560_v62  ;;  %v4588_v62 = vld [vmem:[%s5855_s5 + $0x1c0] sm:$0xff]  }
  0x4e   :  { %4127 = vmatpush3.bf16.msra.mxu0 %v4547_v47  ;;  %v3491_v47 = vcombine.high %v696_v44, %v696_v44 }
  0x4f   :  { %4128 = vmatprep.subr.bf16.mxu0 %v4548_v48 }
  0x52   :  { %4129 = vmatpush3.bf16.msra.mxu0 %v4549_v51  ;;  %v4568_v51 = vld [vmem:[%s5855_s5 + $0x1e8] sm:$0xff]  }
  0x53   :  { %4130 = vmatprep.subr.bf16.mxu0 %v4550_v52  ;;  %v4569_v52 = vld [vmem:[%s5855_s5 + $0x1a8] sm:$0xff]  }
  0x56   :  { %4131 = vmatpush3.bf16.msra.mxu0 %v4551_v53  ;;  %v4572_v53 = vld [vmem:[%s5855_s5 + $0x1e0] sm:$0xff]  }
  0x57   :  { %4132 = vmatprep.subr.bf16.mxu0 %v4552_v54  ;;  %v4573_v54 = vld [vmem:[%s5855_s5 + $0x1a0] sm:$0xff]  }
  0x5a   :  { %4133 = vmatpush3.bf16.msra.mxu0 %v4553_v55  ;;  %v4576_v55 = vld [vmem:[%s5855_s5 + $0x1d8] sm:$0xff]  }
  0x5b   :  { %4167 = vmatprep.subr.bf16.mxu0 %v4562_v63  ;;  %v4589_v63 = vld [vmem:[%s5855_s5 + $0x180] sm:$0xff]  }
  0x5d   :  { %593 = vmatmul.mubr.bf16.vlgmr.msra.gmra.mxu0 %v3335_v56  ;;  %v4577_v56 = vld [vmem:[%s5855_s5 + $0x198] sm:$0xff]  }
  0x5e   :  { %4168 = vmatpush3.bf16.msra.mxu0 %v4563_v0  ;;  %1185 = vmatprep.mubr.bf16.mxu0 %v3493_v16  ;;  %v4594_v0 = vld [vmem:[%s5855_s5 + $0x2f8] sm:$0xff]   ;;  %v4609_v16 = vld [vmem:[%s5855_s5 + $0x288] sm:$0xff]  }
  0x5f   :  { %4169 = vmatprep.subr.bf16.mxu0 %v4566_v1  ;;  %v698_v1 = vld [vmem:[%s5851_s1 + $0x10] sm:$0xff]  ;;  %s3715_s1 = sld [smem:[#allocation2 + $0x2]] }
  0x62   :  { %4170 = vmatpush3.bf16.msra.mxu0 %v4567_v2  ;;  %v3490_v2 = vcombine.low %v696_v44, %v696_v44 }
  0x63   :  { %4171 = vmatprep.subr.bf16.mxu0 %v4570_v3  ;;  %v4597_v3 = vld [vmem:[%s5855_s5 + $0x2b8] sm:$0xff]  }
  0x66   :  { %4172 = vmatpush3.bf16.msra.mxu0 %v4571_v4  ;;  %v3495_v4 = vcombine.high %v698_v1, %v698_v1 }
  0x67   :  { %4173 = vmatprep.subr.bf16.mxu0 %v4574_v5  ;;  %v4598_v5 = vld [vmem:[%s5855_s5 + $0x2f0] sm:$0xff]  }
  0x6a   :  { %4174 = vmatpush3.bf16.msra.mxu0 %v4575_v6  ;;  %v4599_v6 = vld [vmem:[%s5855_s5 + $0x2b0] sm:$0xff]  }
  0x6b   :  { %4175 = vmatprep.subr.bf16.mxu0 %v4578_v7  ;;  %v4600_v7 = vld [vmem:[%s5855_s5 + $0x2e8] sm:$0xff]  }
  0x6e   :  { %4176 = vmatpush3.bf16.msra.mxu0 %v4579_v8  ;;  %v4601_v8 = vld [vmem:[%s5855_s5 + $0x2a8] sm:$0xff]  }
  0x6f   :  { %4177 = vmatprep.subr.bf16.mxu0 %v4582_v9  ;;  %v4602_v9 = vld [vmem:[%s5855_s5 + $0x2e0] sm:$0xff]  }
  0x72   :  { %4178 = vmatpush3.bf16.msra.mxu0 %v4583_v10  ;;  %v4603_v10 = vld [vmem:[%s5855_s5 + $0x2a0] sm:$0xff]  }
  0x73   :  { %4179 = vmatprep.subr.bf16.mxu0 %v4586_v11  ;;  %v4604_v11 = vld [vmem:[%s5855_s5 + $0x2d8] sm:$0xff]  }
  0x76   :  { %4180 = vmatpush3.bf16.msra.mxu0 %v4587_v12  ;;  %v4605_v12 = vld [vmem:[%s5855_s5 + $0x298] sm:$0xff]  }
  0x77   :  { %4181 = vmatprep.subr.bf16.mxu0 %v4590_v13  ;;  %v4606_v13 = vld [vmem:[%s5855_s5 + $0x2d0] sm:$0xff]  }
  0x7a   :  { %4182 = vmatpush3.bf16.msra.mxu0 %v4593_v14  ;;  %v4607_v14 = vld [vmem:[%s5855_s5 + $0x290] sm:$0xff]  }
  0x7b   :  { %4443 = vmatprep.subr.bf16.mxu0 %v4864_v58 }
  0x7d   :  { %1186 = vmatmul.mubr.bf16.vlgmr.msra.gmra.mxu0 %v3492_v17  ;;  %v4610_v17 = vld [vmem:[%s5855_s5 + $0x2c0] sm:$0xff]  }
  0x7e   :  { %4451 = vmatprep.mubr.msk.bf16.mxu0 %vm4865_vm0, %v4864_v58 }
  0xfd   :  { %v4090_v18 = vpop.f32.mrf.mxu0 }
  0xff   :  { %v4091_v19 = vpop.f32.mrf.mxu0  ;;  %v4112_v20 = vpop.f32.mrf.mxu1 }
 0x100   :  { %v4092_v26 = vadd.f32 %v4091_v19, %v4090_v18  ;;  %v4611_v18 = vld [vmem:[%s5855_s5 + $0x280] sm:$0xff]   ;;  %v3494_v19 = vcombine.low %v698_v1, %v698_v1 }
 0x101   :  { %v4093_v21 = vpop.f32.mrf.mxu0  ;;  %v4113_v22 = vpop.f32.mrf.mxu1 }
 0x102   :  { %v515_v28 = vadd.f32 %v4092_v26, %v3330_v27  ;;  %v4114_v29 = vadd.f32 %v4113_v22, %v4112_v20  ;;  %v4615_v26 = vld [vmem:[%s5859_s9 + $0x30] sm:$0xff]   ;;  %v4616_v27 = vld [vmem:[%s5859_s9 + $0x28] sm:$0xff]  }
 0x103   :  { %v4094_v23 = vpop.f32.mrf.mxu0  ;;  %v4115_v24 = vpop.f32.mrf.mxu1 }
 0x104   :  { %v555_v32 = vadd.f32 %v4114_v29, %v515_v28  ;;  %v4617_v28 = vld [vmem:[%s5859_s9 + $0x20] sm:$0xff]   ;;  %v4618_v29 = vld [vmem:[%s5855_s5 + $0x378] sm:$0xff]  }
 0x105   :  { %v4116_v25 = vpop.f32.mrf.mxu1 }
 0x106   :  { %v4614_v25 = vld [vmem:[%s5859_s9 + $0x38] sm:$0xff]  }
 0x107   :  { %4444 = vmatpush3.bf16.msra.mxu0 %v4614_v25  ;;  %v4639_v25 = vld [vmem:[%s5855_s5 + $0x310] sm:$0xff]  }
 0x108   :  { %4445 = vmatprep.subr.bf16.mxu0 %v4864_v58 }
 0x10b   :  { %4446 = vmatpush3.bf16.msra.mxu0 %v4615_v26  ;;  %v4642_v26 = vld [vmem:[%s5855_s5 + $0x348] sm:$0xff]  }
 0x10c   :  { %4447 = vmatprep.subr.bf16.mxu0 %v4864_v58 }
 0x10f   :  { %4448 = vmatpush3.bf16.msra.mxu0 %v4616_v27  ;;  %v4643_v27 = vld [vmem:[%s5855_s5 + $0x308] sm:$0xff]  }
 0x110   :  { %4449 = vmatprep.subr.bf16.mxu0 %v4864_v58 }
 0x113   :  { %4450 = vmatpush3.bf16.msra.mxu0 %v4617_v28  ;;  %v4646_v28 = vld [vmem:[%s5855_s5 + $0x340] sm:$0xff]  }
 0x114   :  { %4216 = vmatprep.subr.bf16.mxu0 %v4618_v29  ;;  %v4647_v29 = vld [vmem:[%s5855_s5 + $0x300] sm:$0xff]  }
 0x11d   :  { %v4134_v30 = vpop.f32.mrf.mxu0 }
 0x11f   :  { %v4135_v31 = vpop.f32.mrf.mxu0 }
 0x120   :  { %v4136_v33 = vadd.f32 %v4135_v31, %v4134_v30  ;;  %v4620_v30 = vld [vmem:[%s5855_s5 + $0x3f8] sm:$0xff]  }
 0x121   :  { %v4137_v34 = vpop.f32.mrf.mxu0  ;;  %v4621_v31 = vld [vmem:[%s5855_s5 + $0x3b8] sm:$0xff]  }
 0x122   :  { %v595_v35 = vadd.f32 %v4136_v33, %v555_v32  ;;  %v4624_v32 = vld [vmem:[%s5855_s5 + $0x3f0] sm:$0xff]   ;;  %v4628_v34 = vld [vmem:[%s5855_s5 + $0x3e8] sm:$0xff]  }
 0x123   :  { %v4138_v36 = vpop.f32.mrf.mxu0  ;;  %v4625_v33 = vld [vmem:[%s5855_s5 + $0x3b0] sm:$0xff]  }
 0x124   :  { %v3385_v37 = vmul.f32 -1.442695, %v595_v35  ;;  %v4629_v35 = vld [vmem:[%s5855_s5 + $0x3a8] sm:$0xff]   ;;  %v4632_v36 = vld [vmem:[%s5855_s5 + $0x3e0] sm:$0xff]  }
 0x126   :  { %4792 = vpow2.f32 %v3385_v37  ;;  %v4633_v37 = vld [vmem:[%s5855_s5 + $0x3a0] sm:$0xff]  }
 0x133   :  { %v4793_v38 = vpop.eup %4792 }
 0x134   :  { %v603_v39 = vadd.f32 1.0, %v4793_v38  ;;  %v4636_v38 = vld [vmem:[%s5855_s5 + $0x3d8] sm:$0xff]  }
 0x136   :  { %4794 = vrcp.f32 %v603_v39  ;;  %v4637_v39 = vld [vmem:[%s5855_s5 + $0x398] sm:$0xff]  }
 0x13d   :  { %v4183_v20 = vpop.f32.mrf.mxu0 }
 0x13f   :  { %v4184_v21 = vpop.f32.mrf.mxu0 }
 0x140   :  { %v5265_v22 = vadd.f32 %v4184_v21, %v4183_v20  ;;  %v4630_v20 = vld [vmem:[%s5855_s5 + $0x360] sm:$0xff]  }
 0x141   :  { %v4186_v23 = vpop.f32.mrf.mxu0  ;;  %v4631_v21 = vld [vmem:[%s5855_s5 + $0x320] sm:$0xff]  }
 0x142   :  { %v4635_v23 = vld [vmem:[%s5855_s5 + $0x318] sm:$0xff]  }
 0x143   :  { %v4795_v41 = vpop.eup %4794  ;;  %v4187_v24 = vpop.f32.mrf.mxu0 }
 0x144   :  { %v608_v43 = vmul.f32 %v4795_v41, %v607_v40  ;;  %v4640_v41 = vld [vmem:[%s5855_s5 + $0x3d0] sm:$0xff]  }
 0x145   :  { %v4638_v24 = vld [vmem:[%s5855_s5 + $0x350] sm:$0xff]  }
 0x146   :  { %v611_v45 = vadd.f32 %v610_v42, %v608_v43  ;;  %v4641_v43 = vld [vmem:[%s5855_s5 + $0x390] sm:$0xff]  }
 0x148   :  { %v612_v48 = vpack.c.bf16 %v611_v45, %v611_v45  ;;  %v4644_v45 = vld [vmem:[%s5855_s5 + $0x3c8] sm:$0xff]  }
 0x14a   :  { %4440 = vmatmul.mubr.msk.bf16.vlgmr.msra.gmra.mxu1 %vm652_vm1, %v612_v48  ;;  %v4648_v48 = vld [vmem:[%s5855_s5 + $0x3c0] sm:$0xff]  }
 0x14b   :  { %4146 = vmatpush3.bf16.msra.mxu1 %v4561_v46  ;;  %1145 = vmatprep.mubr.bf16.mxu1 %v3491_v47  ;;  %v4645_v47 = vld [vmem:[%s5855_s5 + $0x388] sm:$0xff]  }
 0x14c   :  { %4147 = vmatprep.subr.bf16.mxu1 %v4564_v49  ;;  %v4651_v49 = vld [vmem:[%s5855_s5 + $0x380] sm:$0xff]  }
 0x14f   :  { %4148 = vmatpush3.bf16.msra.mxu1 %v4565_v50  ;;  %v1332_v50 = vld [vmem:[%s5852_s2 + $0x8] sm:$0xff] }
 0x150   :  { %4149 = vmatprep.subr.bf16.mxu1 %v4568_v51  ;;  %v3663_v51 = vcombine.high %v1332_v50, %v1332_v50 }
 0x153   :  { %4150 = vmatpush3.bf16.msra.mxu1 %v4569_v52  ;;  %v3662_v52 = vcombine.low %v1332_v50, %v1332_v50 }
 0x154   :  { %4151 = vmatprep.subr.bf16.mxu1 %v4572_v53 }
 0x157   :  { %4152 = vmatpush3.bf16.msra.mxu1 %v4573_v54 }
 0x158   :  { %4153 = vmatprep.subr.bf16.mxu1 %v4576_v55 }
 0x15b   :  { %4154 = vmatpush3.bf16.msra.mxu1 %v4577_v56 }
 0x15c   :  { %4155 = vmatprep.subr.bf16.mxu1 %v4580_v57 }
 0x15f   :  { %4156 = vmatpush3.bf16.msra.mxu1 %v4581_v59  ;;  %v3489_v59 = vld [vmem:[%s5856_s6 + $0x1] ss:$0 sm:$0xff] }
 0x160   :  { %4157 = vmatprep.subr.bf16.mxu1 %v4584_v60 }
 0x163   :  { %4158 = vmatpush3.bf16.msra.mxu1 %v4585_v61 }
 0x164   :  { %4159 = vmatprep.subr.bf16.mxu1 %v4588_v62 }
 0x167   :  { %4160 = vmatpush3.bf16.msra.mxu1 %v4589_v63 }
 0x168   :  { %4189 = vmatprep.subr.bf16.mxu1 %v4594_v0 }
 0x16a   :  { %1146 = vmatmul.mubr.bf16.vlgmr.msra.gmra.mxu1 %v3490_v2 }
 0x16b   :  { %4190 = vmatpush3.bf16.msra.mxu1 %v4597_v3  ;;  %1225 = vmatprep.mubr.bf16.mxu1 %v3495_v4 }
 0x16c   :  { %4191 = vmatprep.subr.bf16.mxu1 %v4598_v5 }
 0x16f   :  { %4192 = vmatpush3.bf16.msra.mxu1 %v4599_v6 }
 0x170   :  { %4193 = vmatprep.subr.bf16.mxu1 %v4600_v7  ;;  %v1240_v7 = vstv %s3545_s25  ;;  %s3716_s25 = sld [smem:[#allocation5 + $0x2]] }
 0x173   :  { %4194 = vmatpush3.bf16.msra.mxu1 %v4601_v8 }
 0x174   :  { %4195 = vmatprep.subr.bf16.mxu1 %v4602_v9  ;;  %v1243_v9 = vstv %s3546_s7 }
 0x177   :  { %4196 = vmatpush3.bf16.msra.mxu1 %v4603_v10 }
 0x178   :  { %4197 = vmatprep.subr.bf16.mxu1 %v4604_v11  ;;  %v1331_v11 = vld [vmem:[%s5852_s2] sm:$0xff] }
 0x17b   :  { %4198 = vmatpush3.bf16.msra.mxu1 %v4605_v12 }
 0x17c   :  { %4199 = vmatprep.subr.bf16.mxu1 %v4606_v13  ;;  %v4619_v13 = vld [vmem:[%s5855_s5 + $0x338] sm:$0xff]  }
 0x17f   :  { %4200 = vmatpush3.bf16.msra.mxu1 %v4607_v14  ;;  %v3661_v14 = vcombine.high %v1331_v11, %v1331_v11 }
 0x180   :  { %4201 = vmatprep.subr.bf16.mxu1 %v4608_v15 }
 0x183   :  { %4202 = vmatpush3.bf16.msra.mxu1 %v4609_v16  ;;  %v4622_v16 = vld [vmem:[%s5855_s5 + $0x370] sm:$0xff]  }
 0x184   :  { %4203 = vmatprep.subr.bf16.mxu1 %v4610_v17  ;;  %v4623_v17 = vld [vmem:[%s5855_s5 + $0x330] sm:$0xff]  }
 0x187   :  { %4204 = vmatpush3.bf16.msra.mxu1 %v4611_v18  ;;  %v4626_v18 = vld [vmem:[%s5855_s5 + $0x368] sm:$0xff]  }
 0x188   :  { %4238 = vmatprep.subr.bf16.mxu1 %v4620_v30  ;;  %v4652_v30 = vld [vmem:[%s5855_s5 + $0x478] sm:$0xff]  }
 0x18a   :  { %1226 = vmatmul.mubr.bf16.vlgmr.msra.gmra.mxu1 %v3494_v19  ;;  %v4627_v19 = vld [vmem:[%s5855_s5 + $0x328] sm:$0xff]  }
 0x18b   :  { %4239 = vmatpush3.bf16.msra.mxu1 %v4621_v31  ;;  %1820 = vmatprep.mubr.bf16.mxu1 %v3663_v51  ;;  %v1333_v31 = vld [vmem:[%s5852_s2 + $0x10] sm:$0xff]  ;;  %s4836_s2 = scalar_lea.vmem %s3321_s23, 16 }
 0x18c   :  { %4240 = vmatprep.subr.bf16.mxu1 %v4624_v32  ;;  %v3660_v32 = vcombine.low %v1331_v11, %v1331_v11  ;;  %v3664_v50 = vcombine.low %v1333_v31, %v1333_v31  ;;  %p4837_p10 = scmp.ne.s32.totalorder %s3321_s23, %s4836_s2 }
 0x18f   :  { %4241 = vmatpush3.bf16.msra.mxu1 %v4625_v33  ;;  %v4655_v33 = vld [vmem:[%s5855_s5 + $0x438] sm:$0xff]  }
 0x190   :  { %4242 = vmatprep.subr.bf16.mxu1 %v4628_v34  ;;  %v3665_v34 = vcombine.high %v1333_v31, %v1333_v31 }
 0x193   :  { %4243 = vmatpush3.bf16.msra.mxu1 %v4629_v35  ;;  %v4656_v35 = vld [vmem:[%s5855_s5 + $0x470] sm:$0xff]  }
 0x194   :  { %4244 = vmatprep.subr.bf16.mxu1 %v4632_v36  ;;  %v4657_v36 = vld [vmem:[%s5855_s5 + $0x430] sm:$0xff]  }
 0x197   :  { %4245 = vmatpush3.bf16.msra.mxu1 %v4633_v37  ;;  %v4658_v37 = vld [vmem:[%s5855_s5 + $0x468] sm:$0xff]  }
 0x198   :  { %4246 = vmatprep.subr.bf16.mxu1 %v4636_v38  ;;  %v4659_v38 = vld [vmem:[%s5855_s5 + $0x428] sm:$0xff]  }
 0x19b   :  { %4247 = vmatpush3.bf16.msra.mxu1 %v4637_v39  ;;  %v4660_v39 = vld [vmem:[%s5855_s5 + $0x460] sm:$0xff]  }
 0x19c   :  { %4248 = vmatprep.subr.bf16.mxu1 %v4640_v41  ;;  %v4661_v41 = vld [vmem:[%s5855_s5 + $0x420] sm:$0xff]  }
 0x19f   :  { %4249 = vmatpush3.bf16.msra.mxu1 %v4641_v43  ;;  %v4663_v43 = vld [vmem:[%s5855_s5 + $0x418] sm:$0xff]  }
 0x1a0   :  { %4250 = vmatprep.subr.bf16.mxu1 %v4644_v45  ;;  %v4665_v45 = vld [vmem:[%s5855_s5 + $0x410] sm:$0xff]  }
 0x1a3   :  { %4251 = vmatpush3.bf16.msra.mxu1 %v4645_v47  ;;  %v4667_v47 = vld [vmem:[%s5855_s5 + $0x408] sm:$0xff]  }
 0x1a4   :  { %4252 = vmatprep.subr.bf16.mxu1 %v4648_v48  ;;  %v4668_v48 = vld [vmem:[%s5855_s5 + $0x440] sm:$0xff]  }
 0x1a7   :  { %4253 = vmatpush3.bf16.msra.mxu1 %v4651_v49  ;;  %v4669_v49 = vld [vmem:[%s5855_s5 + $0x400] sm:$0xff]  }
 0x1a8   :  { %4455 = vmatprep.subr.bf16.mxu1 %v4864_v58 }
 0x1aa   :  { %1821 = vmatmul.mubr.bf16.vlgmr.msra.gmra.mxu1 %v3662_v52 }
 0x1ab   :  { %4463 = vmatprep.mubr.msk.bf16.mxu1 %vm4865_vm0, %v4864_v58 }
 0x20a   :  { %v5315_v40 = vpop.f32.mrf.mxu1 }
 0x20c   :  { %v4441_v42 = vpop.f32.mrf.mxu1 }
 0x20d   :  { %v4662_v42 = vld [vmem:[%s5855_s5 + $0x458] sm:$0xff]  }
 0x20e   :  { %v693_v44 = vpop.f32.mrf.mxu1 }
 0x20f   :  { %v4664_v44 = vld [vmem:[%s5855_s5 + $0x450] sm:$0xff]  }
 0x210   :  { %v4442_v46 = vpop.f32.mrf.mxu1 }
 0x211   :  { %v4666_v46 = vld [vmem:[%s5855_s5 + $0x448] sm:$0xff]  }
 0x22a   :  { %v4161_v53 = vpop.f32.mrf.mxu1 }
 0x22c   :  { %v4162_v54 = vpop.f32.mrf.mxu1 }
 0x22d   :  { %v4163_v57 = vadd.f32 %v4162_v54, %v4161_v53 }
 0x22e   :  { %v4164_v55 = vpop.f32.mrf.mxu1 }
 0x22f   :  { %v1148_v60 = vadd.f32 %v4163_v57, %v3489_v59  ;;  %v4673_v57 = vld [vmem:[%s5859_s9 + $0x50] sm:$0xff]   ;;  %v4674_v59 = vld [vmem:[%s5859_s9 + $0x48] sm:$0xff]  }
 0x230   :  { %v4165_v56 = vpop.f32.mrf.mxu1 }
 0x231   :  { %v1188_v63 = vadd.f32 %v5265_v22, %v1148_v60  ;;  %v4634_v22 = vld [vmem:[%s5855_s5 + $0x358] sm:$0xff]   ;;  %v4675_v60 = vld [vmem:[%s5859_s9 + $0x40] sm:$0xff]  }
 0x232   :  { %v4672_v56 = vld [vmem:[%s5859_s9 + $0x58] sm:$0xff]  }
 0x233   :  { %4456 = vmatpush3.bf16.msra.mxu1 %v4672_v56  ;;  %v4688_v56 = vld [vmem:[%s5855_s5 + $0x660] sm:$0xff]  }
 0x234   :  { %4457 = vmatprep.subr.bf16.mxu1 %v4864_v58 }
 0x237   :  { %4458 = vmatpush3.bf16.msra.mxu1 %v4673_v57  ;;  %v4689_v57 = vld [vmem:[%s5855_s5 + $0x620] sm:$0xff]  }
 0x238   :  { %4459 = vmatprep.subr.bf16.mxu1 %v4864_v58 }
 0x23b   :  { %4460 = vmatpush3.bf16.msra.mxu1 %v4674_v59  ;;  %v4692_v59 = vld [vmem:[%s5855_s5 + $0x658] sm:$0xff]  }
 0x23c   :  { %4461 = vmatprep.subr.bf16.mxu1 %v4864_v58 }
 0x23f   :  { %4462 = vmatpush3.bf16.msra.mxu1 %v4675_v60  ;;  %v4693_v60 = vld [vmem:[%s5855_s5 + $0x618] sm:$0xff]  }
 0x24a   :  { %v4205_v61 = vpop.f32.mrf.mxu1 }
 0x24c   :  { %v4206_v62 = vpop.f32.mrf.mxu1 }
 0x24d   :  { %v4207_v0 = vadd.f32 %v4206_v62, %v4205_v61  ;;  %v4676_v61 = vld [vmem:[%s5855_s5 + $0x678] sm:$0xff]  }
 0x24e   :  { %v4208_v1 = vpop.f32.mrf.mxu1  ;;  %4287 = vmatprep.subr.bf16.mxu1 %v4676_v61  ;;  %v4678_v62 = vld [vmem:[%s5855_s5 + $0x6f8] sm:$0xff]   ;;  %v4696_v61 = vld [vmem:[%s5855_s5 + $0x650] sm:$0xff]  }
 0x24f   :  { %v1228_v2 = vadd.f32 %v4207_v0, %v1188_v63  ;;  %v4679_v63 = vld [vmem:[%s5855_s5 + $0x6b8] sm:$0xff]   ;;  %v4682_v0 = vld [vmem:[%s5855_s5 + $0x6f0] sm:$0xff]  }
 0x250   :  { %v4209_v3 = vpop.f32.mrf.mxu1  ;;  %v4683_v1 = vld [vmem:[%s5855_s5 + $0x6b0] sm:$0xff]  }
 0x251   :  { %v3544_v4 = vmul.f32 -1.442695, %v1228_v2  ;;  %v4686_v2 = vld [vmem:[%s5855_s5 + $0x6e8] sm:$0xff]  }
 0x252   :  { %v4687_v3 = vld [vmem:[%s5855_s5 + $0x6a8] sm:$0xff]  }
 0x253   :  { %4796 = vpow2.f32 %v3544_v4  ;;  %v4690_v4 = vld [vmem:[%s5855_s5 + $0x6e0] sm:$0xff]  }
 0x260   :  { %v4797_v5 = vpop.eup %4796 }
 0x261   :  { %v1236_v6 = vadd.f32 1.0, %v4797_v5  ;;  %v4691_v5 = vld [vmem:[%s5855_s5 + $0x6a0] sm:$0xff]  }
 0x263   :  { %4798 = vrcp.f32 %v1236_v6  ;;  %v4694_v6 = vld [vmem:[%s5855_s5 + $0x6d8] sm:$0xff]  }
 0x26a   :  { %v4254_v51 = vpop.f32.mrf.mxu1 }
 0x26c   :  { %v4255_v52 = vpop.f32.mrf.mxu1 }
 0x26d   :  { %v5445_v53 = vadd.f32 %v4255_v52, %v4254_v51  ;;  %v4680_v52 = vld [vmem:[%s5855_s5 + $0x670] sm:$0xff]  }
 0x26e   :  { %v4257_v54 = vpop.f32.mrf.mxu1 }
 0x26f   :  { %v4684_v54 = vld [vmem:[%s5855_s5 + $0x668] sm:$0xff]  }
 0x270   :  { %v4799_v8 = vpop.eup %4798  ;;  %v4258_v55 = vpop.f32.mrf.mxu1 }
 0x271   :  { %v1241_v10 = vmul.f32 %v4799_v8, %v1240_v7  ;;  %v3386_v7 = vld [vmem:[%s5860_s10] ss:$0 sm:$0xff]  ;;  %v3556_v8 = vld [vmem:[%s5860_s10 + $0x1] ss:$0 sm:$0xff]  ;;  %v4685_v55 = vld [vmem:[%s5855_s5 + $0x628] sm:$0xff]  }
 0x272   :  { %v691_v11 = vadd.f32 %v3386_v7, %v5315_v40 }
 0x273   :  { %v1244_v12 = vadd.f32 %v1243_v9, %v1241_v10  ;;  %v4695_v9 = vld [vmem:[%s5855_s5 + $0x698] sm:$0xff]  }
 0x275   :  { %v1245_v15 = vpack.c.bf16 %v1244_v12, %v1244_v12 }
 0x277   :  { %4452 = vmatmul.mubr.msk.bf16.vlgmr.msra.gmra.mxu0 %vm652_vm1, %v1245_v15  ;;  %v4699_v15 = vld [vmem:[%s5855_s5 + $0x690] sm:$0xff]  }
 0x278   :  { %4217 = vmatpush3.bf16.msra.mxu0 %v4619_v13  ;;  %1780 = vmatprep.mubr.bf16.mxu0 %v3661_v14  ;;  %v4698_v13 = vld [vmem:[%s5855_s5 + $0x6d0] sm:$0xff]  }
 0x279   :  { %4218 = vmatprep.subr.bf16.mxu0 %v4622_v16 }
 0x27c   :  { %4219 = vmatpush3.bf16.msra.mxu0 %v4623_v17 }
 0x27d   :  { %4220 = vmatprep.subr.bf16.mxu0 %v4626_v18  ;;  %v4702_v18 = vld [vmem:[%s5855_s5 + $0x6c8] sm:$0xff]  }
 0x280   :  { %4221 = vmatpush3.bf16.msra.mxu0 %v4627_v19  ;;  %v4703_v19 = vld [vmem:[%s5855_s5 + $0x688] sm:$0xff]  }
 0x281   :  { %4222 = vmatprep.subr.bf16.mxu0 %v4630_v20  ;;  %v4706_v20 = vld [vmem:[%s5855_s5 + $0x6c0] sm:$0xff]  }
 0x284   :  { %4223 = vmatpush3.bf16.msra.mxu0 %v4631_v21  ;;  %v4709_v21 = vld [vmem:[%s5855_s5 + $0x680] sm:$0xff]  }
 0x285   :  { %4224 = vmatprep.subr.bf16.mxu0 %v4634_v22  ;;  %v1967_v22 = vld [vmem:[%s5854_s4 + $0x8] sm:$0xff] }
 0x288   :  { %4225 = vmatpush3.bf16.msra.mxu0 %v4635_v23  ;;  %v3833_v23 = vcombine.high %v1967_v22, %v1967_v22 }
 0x289   :  { %4226 = vmatprep.subr.bf16.mxu0 %v4638_v24  ;;  %v3832_v24 = vcombine.low %v1967_v22, %v1967_v22 }
 0x28c   :  { %4227 = vmatpush3.bf16.msra.mxu0 %v4639_v25 }
 0x28d   :  { %4228 = vmatprep.subr.bf16.mxu0 %v4642_v26 }
 0x290   :  { %4229 = vmatpush3.bf16.msra.mxu0 %v4643_v27 }
 0x291   :  { %4230 = vmatprep.subr.bf16.mxu0 %v4646_v28 }
 0x294   :  { %4231 = vmatpush3.bf16.msra.mxu0 %v4647_v29 }
 0x295   :  { %4260 = vmatprep.subr.bf16.mxu0 %v4652_v30  ;;  %v3659_v30 = vld [vmem:[%s5856_s6 + $0x2] ss:$0 sm:$0xff] }
 0x297   :  { %1781 = vmatmul.mubr.bf16.vlgmr.msra.gmra.mxu0 %v3660_v32 }
 0x298   :  { %4261 = vmatpush3.bf16.msra.mxu0 %v4655_v33  ;;  %1860 = vmatprep.mubr.bf16.mxu0 %v3665_v34 }
 0x299   :  { %4262 = vmatprep.subr.bf16.mxu0 %v4656_v35 }
 0x29c   :  { %4263 = vmatpush3.bf16.msra.mxu0 %v4657_v36 }
 0x29d   :  { %4264 = vmatprep.subr.bf16.mxu0 %v4658_v37 }
 0x2a0   :  { %4265 = vmatpush3.bf16.msra.mxu0 %v4659_v38 }
 0x2a1   :  { %4266 = vmatprep.subr.bf16.mxu0 %v4660_v39 }
 0x2a4   :  { %4267 = vmatpush3.bf16.msra.mxu0 %v4661_v41 }
 0x2a5   :  { %4268 = vmatprep.subr.bf16.mxu0 %v4662_v42 }
 0x2a8   :  { %4269 = vmatpush3.bf16.msra.mxu0 %v4663_v43  ;;  %v1875_v43 = vstv %s3715_s1 }
 0x2a9   :  { %4270 = vmatprep.subr.bf16.mxu0 %v4664_v44 }
 0x2ac   :  { %4271 = vmatpush3.bf16.msra.mxu0 %v4665_v45  ;;  %v1878_v45 = vstv %s3716_s25 }
 0x2ad   :  { %4272 = vmatprep.subr.bf16.mxu0 %v4666_v46 }
 0x2b0   :  { %4273 = vmatpush3.bf16.msra.mxu0 %v4667_v47  ;;  %v1966_v47 = vld [vmem:[%s5854_s4] sm:$0xff] }
 0x2b1   :  { %4274 = vmatprep.subr.bf16.mxu0 %v4668_v48 }
 0x2b4   :  { %4275 = vmatpush3.bf16.msra.mxu0 %v4669_v49  ;;  %v4677_v49 = vld [vmem:[%s5855_s5 + $0x638] sm:$0xff]  }
 0x2b5   :  { %4309 = vmatprep.subr.bf16.mxu0 %v4678_v62  ;;  %v4697_v62 = vld [vmem:[%s5855_s5 + $0x610] sm:$0xff]  }
 0x2b7   :  { %1861 = vmatmul.mubr.bf16.vlgmr.msra.gmra.mxu0 %v3664_v50  ;;  %v3831_v50 = vcombine.high %v1966_v47, %v1966_v47 }
 0x2b8   :  { %4310 = vmatpush3.bf16.msra.mxu0 %v4679_v63  ;;  %2455 = vmatprep.mubr.bf16.mxu0 %v3833_v23  ;;  %v4700_v63 = vld [vmem:[%s5855_s5 + $0x648] sm:$0xff]  }
 0x2b9   :  { %4311 = vmatprep.subr.bf16.mxu0 %v4682_v0  ;;  %v4701_v0 = vld [vmem:[%s5855_s5 + $0x608] sm:$0xff]  }
 0x2bc   :  { %4312 = vmatpush3.bf16.msra.mxu0 %v4683_v1  ;;  %v4704_v1 = vld [vmem:[%s5855_s5 + $0x640] sm:$0xff]  }
 0x2bd   :  { %4313 = vmatprep.subr.bf16.mxu0 %v4686_v2  ;;  %v4705_v2 = vld [vmem:[%s5855_s5 + $0x600] sm:$0xff]  }
 0x2c0   :  { %4314 = vmatpush3.bf16.msra.mxu0 %v4687_v3  ;;  %v4710_v3 = vld [vmem:[%s5855_s5 + $0x778] sm:$0xff]  }
 0x2c1   :  { %4315 = vmatprep.subr.bf16.mxu0 %v4690_v4  ;;  %v1968_v4 = vld [vmem:[%s5854_s4 + $0x10] sm:$0xff] }
 0x2c2   :  { %v3835_v7 = vcombine.high %v1968_v4, %v1968_v4  ;;  %v3834_v22 = vcombine.low %v1968_v4, %v1968_v4 }
 0x2c4   :  { %4316 = vmatpush3.bf16.msra.mxu0 %v4691_v5  ;;  %v3830_v5 = vcombine.low %v1966_v47, %v1966_v47  ;;  %v4756_v47 = vld [vmem:[%s5855_s5 + $0x550] sm:$0xff]  }
 0x2c5   :  { %4317 = vmatprep.subr.bf16.mxu0 %v4694_v6  ;;  %v4713_v6 = vld [vmem:[%s5855_s5 + $0x738] sm:$0xff]  }
 0x2c8   :  { %4318 = vmatpush3.bf16.msra.mxu0 %v4695_v9  ;;  %v4715_v9 = vld [vmem:[%s5855_s5 + $0x730] sm:$0xff]  }
 0x2c9   :  { %4319 = vmatprep.subr.bf16.mxu0 %v4698_v13  ;;  %v4719_v13 = vld [vmem:[%s5855_s5 + $0x720] sm:$0xff]  }
 0x2cc   :  { %4320 = vmatpush3.bf16.msra.mxu0 %v4699_v15  ;;  %v4721_v15 = vld [vmem:[%s5855_s5 + $0x718] sm:$0xff]  }
 0x2cd   :  { %4321 = vmatprep.subr.bf16.mxu0 %v4702_v18  ;;  %v4723_v18 = vld [vmem:[%s5855_s5 + $0x710] sm:$0xff]  }
 0x2d0   :  { %4322 = vmatpush3.bf16.msra.mxu0 %v4703_v19  ;;  %v4725_v19 = vld [vmem:[%s5855_s5 + $0x708] sm:$0xff]  }
 0x2d1   :  { %4323 = vmatprep.subr.bf16.mxu0 %v4706_v20  ;;  %v4726_v20 = vld [vmem:[%s5855_s5 + $0x740] sm:$0xff]  }
 0x2d4   :  { %4324 = vmatpush3.bf16.msra.mxu0 %v4709_v21  ;;  %v4727_v21 = vld [vmem:[%s5855_s5 + $0x700] sm:$0xff]  }
 0x2d5   :  { %4467 = vmatprep.subr.bf16.mxu0 %v4864_v58 }
 0x2d7   :  { %2456 = vmatmul.mubr.bf16.vlgmr.msra.gmra.mxu0 %v3832_v24 }
 0x2d8   :  { %4475 = vmatprep.mubr.msk.bf16.mxu0 %vm4865_vm0, %v4864_v58 }
 0x337   :  { %v1324_v10 = vpop.f32.mrf.mxu0 }
 0x338   :  { %v1325_v12 = vadd.f32 %v3556_v8, %v1324_v10  ;;  %v4714_v8 = vld [vmem:[%s5855_s5 + $0x770] sm:$0xff]   ;;  %v4716_v10 = vld [vmem:[%s5855_s5 + $0x768] sm:$0xff]  }
 0x339   :  { %v4453_v14 = vpop.f32.mrf.mxu0 }
 0x33a   :  { %v5508_v16 = vmul.f32 %v1325_v12, %v691_v11  ;;  %v4717_v11 = vld [vmem:[%s5855_s5 + $0x728] sm:$0xff]   ;;  %v4718_v12 = vld [vmem:[%s5855_s5 + $0x760] sm:$0xff]   ;;  %v4720_v14 = vld [vmem:[%s5855_s5 + $0x758] sm:$0xff]  }
 0x33b   :  { %v1327_v17 = vpop.f32.mrf.mxu0 }
 0x33c   :  { %v4722_v17 = vld [vmem:[%s5855_s5 + $0x750] sm:$0xff]  }
 0x33d   :  { %v4454_v40 = vpop.f32.mrf.mxu0 }
 0x33e   :  { %v4724_v40 = vld [vmem:[%s5855_s5 + $0x748] sm:$0xff]  }
 0x357   :  { %v4232_v25 = vpop.f32.mrf.mxu0 }
 0x359   :  { %v4233_v26 = vpop.f32.mrf.mxu0 }
 0x35a   :  { %v4234_v29 = vadd.f32 %v4233_v26, %v4232_v25 }
 0x35b   :  { %v4235_v27 = vpop.f32.mrf.mxu0 }
 0x35c   :  { %v1783_v31 = vadd.f32 %v4234_v29, %v3659_v30  ;;  %v4731_v29 = vld [vmem:[%s5859_s9 + $0x90] sm:$0xff]   ;;  %v4732_v30 = vld [vmem:[%s5859_s9 + $0x88] sm:$0xff]  }
 0x35d   :  { %v4236_v28 = vpop.f32.mrf.mxu0 }
 0x35e   :  { %v1823_v34 = vadd.f32 %v5445_v53, %v1783_v31  ;;  %v4681_v53 = vld [vmem:[%s5855_s5 + $0x630] sm:$0xff]   ;;  %v4730_v28 = vld [vmem:[%s5859_s9 + $0x98] sm:$0xff]   ;;  %v4733_v31 = vld [vmem:[%s5859_s9 + $0x80] sm:$0xff]  }
 0x35f   :  { %4468 = vmatpush3.bf16.msra.mxu0 %v4730_v28  ;;  %v4750_v28 = vld [vmem:[%s5855_s5 + $0x4d8] sm:$0xff]  }
 0x360   :  { %4469 = vmatprep.subr.bf16.mxu0 %v4864_v58 }
 0x363   :  { %4470 = vmatpush3.bf16.msra.mxu0 %v4731_v29  ;;  %v4751_v29 = vld [vmem:[%s5855_s5 + $0x498] sm:$0xff]  }
 0x364   :  { %4471 = vmatprep.subr.bf16.mxu0 %v4864_v58 }
 0x367   :  { %4472 = vmatpush3.bf16.msra.mxu0 %v4732_v30  ;;  %v4754_v30 = vld [vmem:[%s5855_s5 + $0x4d0] sm:$0xff]  }
 0x368   :  { %4473 = vmatprep.subr.bf16.mxu0 %v4864_v58 }
 0x36b   :  { %4474 = vmatpush3.bf16.msra.mxu0 %v4733_v31  ;;  %v4755_v31 = vld [vmem:[%s5855_s5 + $0x490] sm:$0xff]  }
 0x377   :  { %v4276_v32 = vpop.f32.mrf.mxu0 }
 0x379   :  { %v4277_v33 = vpop.f32.mrf.mxu0 }
 0x37a   :  { %v4278_v35 = vadd.f32 %v4277_v33, %v4276_v32  ;;  %v4734_v32 = vld [vmem:[%s5855_s5 + $0x4f8] sm:$0xff]  }
 0x37b   :  { %v4279_v36 = vpop.f32.mrf.mxu0  ;;  %4358 = vmatprep.subr.bf16.mxu0 %v4734_v32  ;;  %v4736_v33 = vld [vmem:[%s5855_s5 + $0x578] sm:$0xff]   ;;  %v4758_v32 = vld [vmem:[%s5855_s5 + $0x4c8] sm:$0xff]  }
 0x37c   :  { %v1863_v37 = vadd.f32 %v4278_v35, %v1823_v34  ;;  %v4737_v34 = vld [vmem:[%s5855_s5 + $0x538] sm:$0xff]   ;;  %v4740_v35 = vld [vmem:[%s5855_s5 + $0x570] sm:$0xff]  }
 0x37d   :  { %v4280_v38 = vpop.f32.mrf.mxu0  ;;  %v4741_v36 = vld [vmem:[%s5855_s5 + $0x530] sm:$0xff]  }
 0x37e   :  { %v3714_v39 = vmul.f32 -1.442695, %v1863_v37  ;;  %v4744_v37 = vld [vmem:[%s5855_s5 + $0x568] sm:$0xff]  }
 0x37f   :  { %v4745_v38 = vld [vmem:[%s5855_s5 + $0x528] sm:$0xff]  }
 0x380   :  { %4800 = vpow2.f32 %v3714_v39  ;;  %v4748_v39 = vld [vmem:[%s5855_s5 + $0x560] sm:$0xff]  }
 0x38d   :  { %v4801_v41 = vpop.eup %4800 }
 0x38e   :  { %v1871_v42 = vadd.f32 1.0, %v4801_v41  ;;  %v4749_v41 = vld [vmem:[%s5855_s5 + $0x520] sm:$0xff]  }
 0x390   :  { %4802 = vrcp.f32 %v1871_v42  ;;  %v4752_v42 = vld [vmem:[%s5855_s5 + $0x558] sm:$0xff]  }
 0x397   :  { %v4325_v23 = vpop.f32.mrf.mxu0 }
 0x399   :  { %v4326_v24 = vpop.f32.mrf.mxu0 }
 0x39a   :  { %v5632_v25 = vadd.f32 %v4326_v24, %v4325_v23  ;;  %v4739_v23 = vld [vmem:[%s5855_s5 + $0x4b0] sm:$0xff]   ;;  %v4742_v24 = vld [vmem:[%s5855_s5 + $0x4e8] sm:$0xff]  }
 0x39b   :  { %v4328_v26 = vpop.f32.mrf.mxu0 }
 0x39c   :  { %v4746_v26 = vld [vmem:[%s5855_s5 + $0x4e0] sm:$0xff]  }
 0x39d   :  { %v4803_v44 = vpop.eup %4802  ;;  %v4329_v27 = vpop.f32.mrf.mxu0 }
 0x39e   :  { %v1876_v46 = vmul.f32 %v4803_v44, %v1875_v43  ;;  %v3726_v43 = vld [vmem:[%s5860_s10 + $0x2] ss:$0 sm:$0xff]  ;;  %v4753_v44 = vld [vmem:[%s5855_s5 + $0x518] sm:$0xff]  }
 0x39f   :  { %v4747_v27 = vld [vmem:[%s5855_s5 + $0x4a0] sm:$0xff]  }
 0x3a0   :  { %v1879_v48 = vadd.f32 %v1878_v45, %v1876_v46 }
 0x3a2   :  { %v1880_v51 = vpack.c.bf16 %v1879_v48, %v1879_v48 }
 0x3a4   :  { %4464 = vmatmul.mubr.msk.bf16.vlgmr.msra.gmra.mxu1 %vm652_vm1, %v1880_v51 }
 0x3a5   :  { %4288 = vmatpush3.bf16.msra.mxu1 %v4677_v49  ;;  %2415 = vmatprep.mubr.bf16.mxu1 %v3831_v50  ;;  %v4757_v49 = vld [vmem:[%s5855_s5 + $0x510] sm:$0xff]  }
 0x3a6   :  { %4289 = vmatprep.subr.bf16.mxu1 %v4680_v52  ;;  %v4760_v52 = vld [vmem:[%s5855_s5 + $0x548] sm:$0xff]  }
 0x3a9   :  { %4290 = vmatpush3.bf16.msra.mxu1 %v4681_v53 }
 0x3aa   :  { %4291 = vmatprep.subr.bf16.mxu1 %v4684_v54  ;;  %v4761_v54 = vld [vmem:[%s5855_s5 + $0x508] sm:$0xff]  }
 0x3ad   :  { %4292 = vmatpush3.bf16.msra.mxu1 %v4685_v55  ;;  %v4764_v55 = vld [vmem:[%s5855_s5 + $0x540] sm:$0xff]  }
 0x3ae   :  { %4293 = vmatprep.subr.bf16.mxu1 %v4688_v56  ;;  %v2602_v56 = vld [vmem:[%s5853_s3 + $0x8] sm:$0xff] }
 0x3b1   :  { %4294 = vmatpush3.bf16.msra.mxu1 %v4689_v57  ;;  %v4003_v57 = vcombine.high %v2602_v56, %v2602_v56 }
 0x3b2   :  { %4295 = vmatprep.subr.bf16.mxu1 %v4692_v59  ;;  %v4002_v59 = vcombine.low %v2602_v56, %v2602_v56 }
 0x3b5   :  { %4296 = vmatpush3.bf16.msra.mxu1 %v4693_v60 }
 0x3b6   :  { %4297 = vmatprep.subr.bf16.mxu1 %v4696_v61 }
 0x3b9   :  { %4298 = vmatpush3.bf16.msra.mxu1 %v4697_v62 }
 0x3ba   :  { %4299 = vmatprep.subr.bf16.mxu1 %v4700_v63 }
 0x3bd   :  { %4300 = vmatpush3.bf16.msra.mxu1 %v4701_v0 }
 0x3be   :  { %4301 = vmatprep.subr.bf16.mxu1 %v4704_v1  ;;  %v3829_v1 = vld [vmem:[%s5856_s6 + $0x4] ss:$0 sm:$0xff] }
 0x3c1   :  { %4302 = vmatpush3.bf16.msra.mxu1 %v4705_v2 }
 0x3c2   :  { %4331 = vmatprep.subr.bf16.mxu1 %v4710_v3 }
 0x3c4   :  { %2416 = vmatmul.mubr.bf16.vlgmr.msra.gmra.mxu1 %v3830_v5 }
 0x3c5   :  { %4332 = vmatpush3.bf16.msra.mxu1 %v4713_v6  ;;  %2495 = vmatprep.mubr.bf16.mxu1 %v3835_v7 }
 0x3c6   :  { %4333 = vmatprep.subr.bf16.mxu1 %v4714_v8 }
 0x3c9   :  { %4334 = vmatpush3.bf16.msra.mxu1 %v4715_v9 }
 0x3ca   :  { %4335 = vmatprep.subr.bf16.mxu1 %v4716_v10 }
 0x3cd   :  { %4336 = vmatpush3.bf16.msra.mxu1 %v4717_v11 }
 0x3ce   :  { %4337 = vmatprep.subr.bf16.mxu1 %v4718_v12 }
 0x3d1   :  { %4338 = vmatpush3.bf16.msra.mxu1 %v4719_v13  ;;  %v2510_v13 = vstv %s3885_s20 }
 0x3d2   :  { %4339 = vmatprep.subr.bf16.mxu1 %v4720_v14 }
 0x3d5   :  { %4340 = vmatpush3.bf16.msra.mxu1 %v4721_v15  ;;  %v2513_v15 = vstv %s3886_s21  ;;  %s4055_s21 = sld [smem:[#allocation2 + $0x3]] }
 0x3d6   :  { %4341 = vmatprep.subr.bf16.mxu1 %v4722_v17 }
 0x3d9   :  { %4342 = vmatpush3.bf16.msra.mxu1 %v4723_v18  ;;  %v2601_v18 = vld [vmem:[%s5853_s3] sm:$0xff] }
 0x3da   :  { %4343 = vmatprep.subr.bf16.mxu1 %v4724_v40 }
 0x3dd   :  { %4344 = vmatpush3.bf16.msra.mxu1 %v4725_v19  ;;  %v4735_v19 = vld [vmem:[%s5855_s5 + $0x4b8] sm:$0xff]  }
 0x3de   :  { %4345 = vmatprep.subr.bf16.mxu1 %v4726_v20  ;;  %v4001_v20 = vcombine.high %v2601_v18, %v2601_v18 }
 0x3e1   :  { %4346 = vmatpush3.bf16.msra.mxu1 %v4727_v21 }
 0x3e2   :  { %4380 = vmatprep.subr.bf16.mxu1 %v4736_v33  ;;  %v4759_v33 = vld [vmem:[%s5855_s5 + $0x488] sm:$0xff]  }
 0x3e4   :  { %2496 = vmatmul.mubr.bf16.vlgmr.msra.gmra.mxu1 %v3834_v22  ;;  %v4738_v22 = vld [vmem:[%s5855_s5 + $0x4f0] sm:$0xff]  }
 0x3e5   :  { %4381 = vmatpush3.bf16.msra.mxu1 %v4737_v34  ;;  %3090 = vmatprep.mubr.bf16.mxu1 %v4003_v57  ;;  %v4762_v34 = vld [vmem:[%s5855_s5 + $0x4c0] sm:$0xff]  }
 0x3e6   :  { %4382 = vmatprep.subr.bf16.mxu1 %v4740_v35  ;;  %v4763_v35 = vld [vmem:[%s5855_s5 + $0x480] sm:$0xff]  }
 0x3e9   :  { %4383 = vmatpush3.bf16.msra.mxu1 %v4741_v36  ;;  %v4768_v36 = vld [vmem:[%s5855_s5 + $0x5f8] sm:$0xff]  }
 0x3ea   :  { %4384 = vmatprep.subr.bf16.mxu1 %v4744_v37  ;;  %v2603_v37 = vld [vmem:[%s5853_s3 + $0x10] sm:$0xff] }
 0x3eb   :  { %v4004_v56 = vcombine.low %v2603_v37, %v2603_v37 }
 0x3ed   :  { %4385 = vmatpush3.bf16.msra.mxu1 %v4745_v38  ;;  %v4000_v38 = vcombine.low %v2601_v18, %v2601_v18 }
 0x3ee   :  { %4386 = vmatprep.subr.bf16.mxu1 %v4748_v39  ;;  %v4771_v39 = vld [vmem:[%s5855_s5 + $0x5b8] sm:$0xff]  }
 0x3f1   :  { %4387 = vmatpush3.bf16.msra.mxu1 %v4749_v41  ;;  %v4005_v41 = vcombine.high %v2603_v37, %v2603_v37 }
 0x3f2   :  { %4388 = vmatprep.subr.bf16.mxu1 %v4752_v42  ;;  %v4772_v42 = vld [vmem:[%s5855_s5 + $0x5f0] sm:$0xff]  }
 0x3f5   :  { %4389 = vmatpush3.bf16.msra.mxu1 %v4753_v44  ;;  %v4774_v44 = vld [vmem:[%s5855_s5 + $0x5e8] sm:$0xff]  }
 0x3f6   :  { %4390 = vmatprep.subr.bf16.mxu1 %v4756_v47  ;;  %v4777_v47 = vld [vmem:[%s5855_s5 + $0x5a0] sm:$0xff]  }
 0x3f9   :  { %4391 = vmatpush3.bf16.msra.mxu1 %v4757_v49  ;;  %v4779_v49 = vld [vmem:[%s5855_s5 + $0x598] sm:$0xff]  }
 0x3fa   :  { %4392 = vmatprep.subr.bf16.mxu1 %v4760_v52  ;;  %v4781_v52 = vld [vmem:[%s5855_s5 + $0x590] sm:$0xff]  }
 0x3fd   :  { %4393 = vmatpush3.bf16.msra.mxu1 %v4761_v54  ;;  %v4783_v54 = vld [vmem:[%s5855_s5 + $0x588] sm:$0xff]  }
 0x3fe   :  { %4394 = vmatprep.subr.bf16.mxu1 %v4764_v55  ;;  %v4784_v55 = vld [vmem:[%s5855_s5 + $0x5c0] sm:$0xff]  }
 0x464   :  { %v1959_v45 = vpop.f32.mrf.mxu1 }
 0x465   :  { %v1960_v46 = vadd.f32 %v3726_v43, %v1959_v45  ;;  %v4773_v43 = vld [vmem:[%s5855_s5 + $0x5b0] sm:$0xff]   ;;  %v4775_v45 = vld [vmem:[%s5855_s5 + $0x5a8] sm:$0xff]  }
 0x466   :  { %v4465_v48 = vpop.f32.mrf.mxu1 }
 0x467   :  { %v5692_v50 = vmul.f32 %v1960_v46, %v5508_v16  ;;  %v4767_v16 = vld [vmem:[%s5855_s5 + $0x500] sm:$0xff]   ;;  %v4778_v48 = vld [vmem:[%s5855_s5 + $0x5d8] sm:$0xff]  }
 0x468   :  { %v1962_v51 = vpop.f32.mrf.mxu1  ;;  %4395 = vmatpush3.bf16.msra.mxu1 %v4767_v16  ;;  %v4776_v46 = vld [vmem:[%s5855_s5 + $0x5e0] sm:$0xff]  }
 0x469   :  { %4479 = vmatprep.subr.bf16.mxu1 %v4864_v58  ;;  %v4780_v51 = vld [vmem:[%s5855_s5 + $0x5d0] sm:$0xff]   ;;  %v4785_v16 = vld [vmem:[%s5855_s5 + $0x580] sm:$0xff]  }
 0x46a   :  { %v4466_v53 = vpop.f32.mrf.mxu1 }
 0x46b   :  { %3091 = vmatmul.mubr.bf16.vlgmr.msra.gmra.mxu1 %v4002_v59  ;;  %v4782_v53 = vld [vmem:[%s5855_s5 + $0x5c8] sm:$0xff]  }
 0x46c   :  { %4487 = vmatprep.mubr.msk.bf16.mxu1 %vm4865_vm0, %v4864_v58 }
 0x484   :  { %v4303_v60 = vpop.f32.mrf.mxu1 }
 0x486   :  { %v4304_v61 = vpop.f32.mrf.mxu1 }
 0x487   :  { %v4305_v0 = vadd.f32 %v4304_v61, %v4303_v60 }
 0x488   :  { %v4306_v62 = vpop.f32.mrf.mxu1 }
 0x489   :  { %v2418_v2 = vadd.f32 %v4305_v0, %v3829_v1  ;;  %v4789_v0 = vld [vmem:[%s5859_s9 + $0x70] sm:$0xff]   ;;  %v4790_v1 = vld [vmem:[%s5859_s9 + $0x68] sm:$0xff]  }
 0x48a   :  { %v4307_v63 = vpop.f32.mrf.mxu1 }
 0x48b   :  { %v2458_v5 = vadd.f32 %v5632_v25, %v2418_v2  ;;  %v4743_v25 = vld [vmem:[%s5855_s5 + $0x4a8] sm:$0xff]   ;;  %v4788_v63 = vld [vmem:[%s5859_s9 + $0x78] sm:$0xff]   ;;  %v4791_v2 = vld [vmem:[%s5859_s9 + $0x60] sm:$0xff]  }
 0x48c   :  { %4480 = vmatpush3.bf16.msra.mxu1 %v4788_v63 }
 0x48d   :  { %4481 = vmatprep.subr.bf16.mxu1 %v4864_v58 }
 0x490   :  { %4482 = vmatpush3.bf16.msra.mxu1 %v4789_v0 }
 0x491   :  { %4483 = vmatprep.subr.bf16.mxu1 %v4864_v58 }
 0x494   :  { %4484 = vmatpush3.bf16.msra.mxu1 %v4790_v1 }
 0x495   :  { %4485 = vmatprep.subr.bf16.mxu1 %v4864_v58 }
 0x498   :  { %4486 = vmatpush3.bf16.msra.mxu1 %v4791_v2 }
 0x499   :  { %4491 = vmatprep.subr.mxu1 %v4864_v58 }
 0x4a4   :  { %v4347_v3 = vpop.f32.mrf.mxu1 }
 0x4a6   :  { %v4348_v4 = vpop.f32.mrf.mxu1 }
 0x4a7   :  { %v4349_v6 = vadd.f32 %v4348_v4, %v4347_v3  ;;  %v3896_v3 = vld [vmem:[%s5860_s10 + $0x4] ss:$0 sm:$0xff] }
 0x4a8   :  { %v4350_v7 = vpop.f32.mrf.mxu1 }
 0x4a9   :  { %v2498_v8 = vadd.f32 %v4349_v6, %v2458_v5 }
 0x4aa   :  { %v4351_v9 = vpop.f32.mrf.mxu1 }
 0x4ab   :  { %v3884_v10 = vmul.f32 -1.442695, %v2498_v8 }
 0x4ad   :  { %4804 = vpow2.f32 %v3884_v10 }
 0x4ba   :  { %v4805_v11 = vpop.eup %4804 }
 0x4bb   :  { %v2506_v12 = vadd.f32 1.0, %v4805_v11 }
 0x4bd   :  { %4806 = vrcp.f32 %v2506_v12 }
 0x4ca   :  { %v4807_v14 = vpop.eup %4806 }
 0x4cb   :  { %v2511_v17 = vmul.f32 %v4807_v14, %v2510_v13 }
 0x4cd   :  { %v2514_v40 = vadd.f32 %v2513_v15, %v2511_v17  ;;  %v3999_v15 = vld [vmem:[%s5856_s6 + $0x3] ss:$0 sm:$0xff] }
 0x4cf   :  { %v2515_v21 = vpack.c.bf16 %v2514_v40, %v2514_v40 }
 0x4d1   :  { %4476 = vmatmul.mubr.msk.bf16.vlgmr.msra.gmra.mxu0 %vm652_vm1, %v2515_v21 }
 0x4d2   :  { %4359 = vmatpush3.bf16.msra.mxu0 %v4735_v19  ;;  %3050 = vmatprep.mubr.bf16.mxu0 %v4001_v20 }
 0x4d3   :  { %4360 = vmatprep.subr.bf16.mxu0 %v4738_v22 }
 0x4d6   :  { %4361 = vmatpush3.bf16.msra.mxu0 %v4739_v23 }
 0x4d7   :  { %4362 = vmatprep.subr.bf16.mxu0 %v4742_v24 }
 0x4da   :  { %4363 = vmatpush3.bf16.msra.mxu0 %v4743_v25 }
 0x4db   :  { %4364 = vmatprep.subr.bf16.mxu0 %v4746_v26  ;;  %v3145_v26 = vstv %s4055_s21 }
 0x4de   :  { %4365 = vmatpush3.bf16.msra.mxu0 %v4747_v27 }
 0x4df   :  { %4366 = vmatprep.subr.bf16.mxu0 %v4750_v28  ;;  %v3148_v28 = vstv %s4056_s0 }
 0x4e2   :  { %4367 = vmatpush3.bf16.msra.mxu0 %v4751_v29 }
 0x4e3   :  { %4368 = vmatprep.subr.bf16.mxu0 %v4754_v30 }
 0x4e6   :  { %4369 = vmatpush3.bf16.msra.mxu0 %v4755_v31 }
 0x4e7   :  { %4370 = vmatprep.subr.bf16.mxu0 %v4758_v32  ;;  %v4066_v32 = vld [vmem:[%s5860_s10 + $0x3] ss:$0 sm:$0xff]  ;;  %s4840_s10 = scalar_lea.vmem %s3321_s23, 32 }
 0x4e8   :  { %p4842_p12 = scmp.lt.s32.totalorder %s4840_s10, %s4836_s2 }
 0x4ea   :  { %4371 = vmatpush3.bf16.msra.mxu0 %v4759_v33  ;;  %p4843_p13 = por %p4842_p12, %p4841_p11 }
 0x4eb   :  { %4372 = vmatprep.subr.bf16.mxu0 %v4762_v34 }
 0x4ec   :  { %p4844_p0 = pnand %p4843_p13, %p4837_p10 }
 0x4ee   :  { %4373 = vmatpush3.bf16.msra.mxu0 %v4763_v35 }
 0x4ef   :  { %4402 = vmatprep.subr.bf16.mxu0 %v4768_v36 }
 0x4f1   :  { %3051 = vmatmul.mubr.bf16.vlgmr.msra.gmra.mxu0 %v4000_v38 }
 0x4f2   :  { %4403 = vmatpush3.bf16.msra.mxu0 %v4771_v39  ;;  %3130 = vmatprep.mubr.bf16.mxu0 %v4005_v41  ;;  %v4866_v39 = vmov 0.015625  }
 0x4f3   :  { %4404 = vmatprep.subr.bf16.mxu0 %v4772_v42 }
 0x4f6   :  { %4405 = vmatpush3.bf16.msra.mxu0 %v4773_v43 }
 0x4f7   :  { %4406 = vmatprep.subr.bf16.mxu0 %v4774_v44 }
 0x4fa   :  { %4407 = vmatpush3.bf16.msra.mxu0 %v4775_v45 }
 0x4fb   :  { %4408 = vmatprep.subr.bf16.mxu0 %v4776_v46 }
 0x4fe   :  { %4409 = vmatpush3.bf16.msra.mxu0 %v4777_v47 }
 0x4ff   :  { %4410 = vmatprep.subr.bf16.mxu0 %v4778_v48 }
 0x502   :  { %4411 = vmatpush3.bf16.msra.mxu0 %v4779_v49 }
 0x503   :  { %4412 = vmatprep.subr.bf16.mxu0 %v4780_v51 }
 0x506   :  { %4413 = vmatpush3.bf16.msra.mxu0 %v4781_v52 }
 0x507   :  { %4414 = vmatprep.subr.bf16.mxu0 %v4782_v53 }
 0x50a   :  { %4415 = vmatpush3.bf16.msra.mxu0 %v4783_v54 }
 0x50b   :  { %4416 = vmatprep.subr.bf16.mxu0 %v4784_v55 }
 0x50e   :  { %4417 = vmatpush3.bf16.msra.mxu0 %v4785_v16 }
 0x511   :  { %3131 = vmatmul.mubr.bf16.vlgmr.msra.gmra.mxu0 %v4004_v56 }
 0x52b   :  { %v4396_v57 = vpop.f32.mrf.mxu1 }
 0x52d   :  { %v4397_v59 = vpop.f32.mrf.mxu1 }
 0x52e   :  { %v4398_v60 = vadd.f32 %v4397_v59, %v4396_v57 }
 0x52f   :  { %v4399_v61 = vpop.f32.mrf.mxu1 }
 0x531   :  { %v4400_v62 = vpop.f32.mrf.mxu1 }
 0x591   :  { %v2594_v4 = vpop.f32.mrf.mxu0 }
 0x592   :  { %v2595_v5 = vadd.f32 %v3896_v3, %v2594_v4 }
 0x593   :  { %v4477_v6 = vpop.f32.mrf.mxu0 }
 0x594   :  { %v2600_v7 = vmul.f32 %v2595_v5, %v5692_v50 }
 0x595   :  { %v2597_v8 = vpop.f32.mrf.mxu0 }
 0x597   :  { %v4478_v9 = vpop.f32.mrf.mxu0 }
 0x5b1   :  { %v4374_v10 = vpop.f32.mrf.mxu0 }
 0x5b3   :  { %v4375_v11 = vpop.f32.mrf.mxu0 }
 0x5b4   :  { %v4376_v14 = vadd.f32 %v4375_v11, %v4374_v10 }
 0x5b5   :  { %v4377_v12 = vpop.f32.mrf.mxu0 }
 0x5b6   :  { %v3053_v17 = vadd.f32 %v4376_v14, %v3999_v15 }
 0x5b7   :  { %v4378_v13 = vpop.f32.mrf.mxu0 }
 0x5b8   :  { %v3093_v19 = vadd.f32 %v4398_v60, %v3053_v17 }
 0x5d1   :  { %v4418_v18 = vpop.f32.mrf.mxu0 }
 0x5d3   :  { %v4419_v40 = vpop.f32.mrf.mxu0 }
 0x5d4   :  { %v4420_v20 = vadd.f32 %v4419_v40, %v4418_v18 }
 0x5d5   :  { %v4421_v21 = vpop.f32.mrf.mxu0 }
 0x5d6   :  { %v3133_v22 = vadd.f32 %v4420_v20, %v3093_v19 }
 0x5d7   :  { %v4422_v23 = vpop.f32.mrf.mxu0 }
 0x5d8   :  { %v4054_v50 = vmul.f32 -1.442695, %v3133_v22 }
 0x5da   :  { %4808 = vpow2.f32 %v4054_v50 }
 0x5e7   :  { %v4809_v24 = vpop.eup %4808 }
 0x5e8   :  { %v3141_v25 = vadd.f32 1.0, %v4809_v24 }
 0x5ea   :  { %4810 = vrcp.f32 %v3141_v25 }
 0x5f7   :  { %v4811_v27 = vpop.eup %4810 }
 0x5f8   :  { %v3146_v29 = vmul.f32 %v4811_v27, %v3145_v26 }
 0x5fa   :  { %v3149_v30 = vadd.f32 %v3148_v28, %v3146_v29 }
 0x5fc   :  { %v3150_v31 = vpack.c.bf16 %v3149_v30, %v3149_v30 }
 0x5fe   :  { %4488 = vmatmul.mubr.msk.bf16.vlgmr.msra.gmra.mxu1 %vm652_vm1, %v3150_v31 }
 0x5ff   :  { %4493 = vmatprep.mubr.msk.f32.mxu1 %vm4865_vm0, %v4864_v58 }
 0x6be   :  { %v3229_v33 = vpop.f32.mrf.mxu1 }
 0x6bf   :  { %v3230_v34 = vadd.f32 %v4066_v32, %v3229_v33 }
 0x6c0   :  { %v4489_v35 = vpop.f32.mrf.mxu1 }
 0x6c1   :  { %v3235_v36 = vmul.f32 %v3230_v34, %v2600_v7 }
 0x6c2   :  { %v3232_v37 = vpop.f32.mrf.mxu1 }
 0x6c3   :  { %4492 = vmatpush3.xpose.msk.msra.mxu1 %vm652_vm1, %v3235_v36 }
 0x6c4   :  { %v4490_v38 = vpop.f32.mrf.mxu1 }
 0x6c6   :  { %4494 = vmatmul.mubr.msk.f32.vlgmr.msra.gmra.mxu1 %vm652_vm1, %v4866_v39 }
 0x786   :  { %v3308_v58 = vpop.f32.mrf.mxu1 }
 0x787   :  { %3313 = vst.msk [vmem:[#allocation7] sm:$0x1] %vm3312_vm2, %v3308_v58 }
 0x788   :  { %v4495_v41 = vpop.f32.mrf.mxu1 }
 0x789   :  { %4847 = shalt.err (!%p4844_p0)
}
 0x78a   :  { %3323 = dma.vmem_to_hbm [thread:$0]  %s3321_s23, 16, %s5861_s11, [#allocation3]  }
 0x78b   :  { %4860 = dma.done.wait [#allocation3], 16  }
 0x78c   :  { %4861 = vsyncadd [#allocation3], 4294967280 }
 0x78d   :  { %3327 = vsyncpa [#allocation3], 1 }
 0x78e   :  { %3328 = vsyncpa [#allocation4], 1 }
 0x78f   :  { %3329 = vsyncpa [#allocation6], 1 }

</bundles_post_ra>
